<compile_context>
chip_gen: v7x
topology: tpu7x:2x2x1
jax: 0.10.0
libtpu: 0.0.40
codegen_flags: <defaults>
</compile_context>

<pallas_src>
import jax
import jax.numpy as jnp
from jax.experimental import pallas as pl
from jax.experimental.pallas import tpu as pltpu


# ----------------------------------------------------------------------------
# Pallas kernel: full encoder stack.  Grid = (batch, layer).
# ----------------------------------------------------------------------------
def make_encoder_stack_kernel(T, D, H, dk, dv, Dh, KS, PADW, L):
    inv_temp = 1.0 / (float(dk) ** 0.5)
    eps = 1e-5
    HDK = H * dk

    def layer_norm(v, g, b):
        mu = jnp.mean(v, axis=-1, keepdims=True)
        var = jnp.mean((v - mu) ** 2, axis=-1, keepdims=True)
        return (v - mu) * jax.lax.rsqrt(var + eps) * g + b

    def kernel(x_ref, kmask_ref, npm_ref,
               wqkv_ref, bqkv_ref, wfc_ref, bfc_ref, g1_ref, b1_ref,
               cw1_ref, cb1_ref, cw2_ref, cb2_ref, g2_ref, b2_ref,
               out_ref, act_ref, ypad_ref):
        l = pl.program_id(1)

        # Layer 0: load the embedding block into the resident activation scratch.
        @pl.when(l == 0)
        def _():
            act_ref[...] = x_ref[...]

        x = act_ref[...]                         # (T, D) f32, resident across layers
        neg = kmask_ref[...] * (-1e9)            # (1, T) additive key-PAD mask
        npad = npm_ref[...]                      # (T, 1) non-pad mask

        # ---- fused QKV projection: one wide MXU pass ----
        xb = x.astype(jnp.bfloat16)
        qkv = jnp.dot(xb, wqkv_ref[...],
                      preferred_element_type=jnp.float32) + bqkv_ref[...]
        qkvb = qkv.astype(jnp.bfloat16)          # (T, 3*H*dk)

        # ---- multi-head attention; heads accumulate directly into fc output ----
        attn_out = jnp.broadcast_to(bfc_ref[...], (T, D)).astype(jnp.float32)
        for h in range(H):
            qh = qkvb[:, h * dk:(h + 1) * dk]
            kh = qkvb[:, HDK + h * dk:HDK + (h + 1) * dk]
            vh = qkvb[:, 2 * HDK + h * dv:2 * HDK + (h + 1) * dv]
            s = jnp.einsum('qd,kd->qk', qh, kh,
                           preferred_element_type=jnp.float32) * inv_temp
            s = s + neg                                  # mask PAD keys
            s = s - jnp.max(s, axis=-1, keepdims=True)   # stable softmax
            e = jnp.exp(s)
            p = e * pl.reciprocal(jnp.sum(e, axis=-1, keepdims=True), approx=True)
            head = jnp.dot(p.astype(jnp.bfloat16), vh,
                           preferred_element_type=jnp.float32)        # (T, dv)
            # concat + fc  ==  sum_h head_h @ Wfc[h]   (no lane concatenate)
            attn_out = attn_out + jnp.dot(head.astype(jnp.bfloat16), wfc_ref[h],
                                          preferred_element_type=jnp.float32)

        y = layer_norm(attn_out + x, g1_ref[...], b1_ref[...])
        y = y * npad

        # ---- position-wise FFN: Conv1d(k=KS, pad=PADW) -> ReLU -> Conv1d(k=1) ----
        ypad_ref[...] = jnp.zeros_like(ypad_ref)
        ypad_ref[PADW:PADW + T, :] = y
        h1 = jnp.broadcast_to(cb1_ref[...], (T, Dh)).astype(jnp.float32)
        for kk in range(KS):
            tap = ypad_ref[kk:kk + T, :].astype(jnp.bfloat16)
            h1 = h1 + jnp.dot(tap, cw1_ref[kk],
                              preferred_element_type=jnp.float32)
        h1 = jnp.maximum(h1, 0.0)
        z = jnp.dot(h1.astype(jnp.bfloat16), cw2_ref[...],
                    preferred_element_type=jnp.float32) + cb2_ref[...]
        z = layer_norm(z + y, g2_ref[...], b2_ref[...])
        z = z * npad

        act_ref[...] = z                        # stays resident for the next layer

        @pl.when(l == L - 1)
        def _():
            out_ref[...] = z

    return kernel


# ----------------------------------------------------------------------------
# Wrapper: one pallas_call over grid (B, L).
# ----------------------------------------------------------------------------
def encoder_pallas(x, key_pad_mask, non_pad_mask, stacked, cfg):
    B, T, D = x.shape
    L = cfg['encoder_n_layer']
    H = cfg['encoder_head']
    dk = dv = D // H
    Dh = cfg['encoder_conv1d_filter_size']
    KS, PADW = cfg['conv_kernel'], cfg['conv_pad']

    kernel = make_encoder_stack_kernel(T, D, H, dk, dv, Dh, KS, PADW, L)

    batch_map = lambda b, l: (b, 0, 0)
    layer_map3 = lambda b, l: (l, 0, 0)
    layer_map4 = lambda b, l: (l, 0, 0, 0)

    in_specs = [
        pl.BlockSpec((None, T, D), batch_map),        # embeddings
        pl.BlockSpec((None, 1, T), batch_map),        # key-PAD mask (vector, not TxT)
        pl.BlockSpec((None, T, 1), batch_map),        # non-pad mask
        pl.BlockSpec((None, D, 3 * D), layer_map3),   # fused wqkv
        pl.BlockSpec((None, 1, 3 * D), layer_map3),   # fused qkv bias
        pl.BlockSpec((None, H, dv, D), layer_map4),   # fc weight, head-split
        pl.BlockSpec((None, 1, D), layer_map3),       # fc bias
        pl.BlockSpec((None, 1, D), layer_map3),       # ln1 gamma
        pl.BlockSpec((None, 1, D), layer_map3),       # ln1 beta
        pl.BlockSpec((None, KS, D, Dh), layer_map4),  # conv1 weight (tap-major)
        pl.BlockSpec((None, 1, Dh), layer_map3),      # conv1 bias
        pl.BlockSpec((None, Dh, D), layer_map3),      # conv2 (k=1) weight
        pl.BlockSpec((None, 1, D), layer_map3),       # conv2 bias
        pl.BlockSpec((None, 1, D), layer_map3),       # ln2 gamma
        pl.BlockSpec((None, 1, D), layer_map3),       # ln2 beta
    ]

    out = pl.pallas_call(
        kernel,
        out_shape=jax.ShapeDtypeStruct((B, T, D), jnp.float32),
        grid_spec=pltpu.PrefetchScalarGridSpec(
            num_scalar_prefetch=0,
            grid=(B, L),
            in_specs=in_specs,
            out_specs=pl.BlockSpec((None, T, D), batch_map),
            scratch_shapes=[
                pltpu.VMEM((T, D), jnp.float32),             # resident activation
                pltpu.VMEM((T + 2 * PADW, D), jnp.float32),  # zero-padded conv input
            ],
        ),
        compiler_params=pltpu.CompilerParams(
            dimension_semantics=("parallel", "arbitrary"),
        ),
    )(x, key_pad_mask, non_pad_mask,
      stacked['wqkv'], stacked['bqkv'], stacked['wfc'], stacked['bfc'],
      stacked['g1'], stacked['b1'], stacked['cw1'], stacked['cb1'],
      stacked['cw2'], stacked['cb2'], stacked['g2'], stacked['b2'])
    return out


# ----------------------------------------------------------------------------
# Parameter init (deterministic, synthetic — matches nn.Module shapes, stacked).
# ----------------------------------------------------------------------------
def init_params(key, cfg):
    D = cfg['encoder_dim']
    H = cfg['encoder_head']
    dk = dv = D // H
    Dh = cfg['encoder_conv1d_filter_size']
    KS = cfg['conv_kernel']
    L = cfg['encoder_n_layer']
    vocab = cfg['vocab_size']
    n_pos = cfg['max_seq_len'] + 1
    PAD = cfg['PAD']

    def nrm(k, shape, scale=0.1):
        return scale * jax.random.normal(k, shape, dtype=jnp.float32)

    keys = jax.random.split(key, 2 + L)
    word_emb = nrm(keys[0], (vocab, D)).at[PAD].set(0.0)   # padding_idx=PAD
    pos_emb = nrm(keys[1], (n_pos, D)).at[PAD].set(0.0)    # padding_idx=PAD

    wqkv, wfc, cw1, cw2 = [], [], [], []
    for li in range(L):
        ks = jax.random.split(keys[2 + li], 5)
        wq = nrm(ks[0], (D, H * dk))
        wk = nrm(ks[1], (D, H * dk))
        wv = nrm(ks[2], (D, H * dv))
        wqkv.append(jnp.concatenate([wq, wk, wv], axis=-1))     # (D, 3*H*dk)
        wfc.append(nrm(ks[3], (H * dv, D)).reshape(H, dv, D))   # head-grouped fc
        cw1.append(nrm(ks[4], (KS, D, Dh)))                     # tap-major conv1
        cw2.append(nrm(jax.random.fold_in(ks[4], 1), (Dh, D)))  # conv2 (k=1)

    stacked = dict(
        wqkv=jnp.stack(wqkv).astype(jnp.bfloat16),
        bqkv=jnp.zeros((L, 1, 3 * H * dk), jnp.float32),
        wfc=jnp.stack(wfc).astype(jnp.bfloat16),
        bfc=jnp.zeros((L, 1, D), jnp.float32),
        g1=jnp.ones((L, 1, D), jnp.float32),
        b1=jnp.zeros((L, 1, D), jnp.float32),
        cw1=jnp.stack(cw1).astype(jnp.bfloat16),
        cb1=jnp.zeros((L, 1, Dh), jnp.float32),
        cw2=jnp.stack(cw2).astype(jnp.bfloat16),
        cb2=jnp.zeros((L, 1, D), jnp.float32),
        g2=jnp.ones((L, 1, D), jnp.float32),
        b2=jnp.zeros((L, 1, D), jnp.float32),
    )
    return {'word_emb': word_emb, 'pos_emb': pos_emb, 'stacked': stacked}


# ----------------------------------------------------------------------------
# Encoder forward (mirrors Encoder.forward).
# ----------------------------------------------------------------------------
def encoder_forward(src_seq, src_pos, params, cfg):
    PAD = cfg['PAD']
    # key-PAD vector (B, 1, T); expanded to (T, T) additively inside the kernel
    key_pad = (src_seq == PAD).astype(jnp.float32)[:, None, :]
    # get_non_pad_mask: (B, T, 1) float
    non_pad = (src_seq != PAD).astype(jnp.float32)[..., None]

    # embedding lookups (gather glue; padding rows are zero)
    x = (jnp.take(params['word_emb'], src_seq, axis=0) +
         jnp.take(params['pos_emb'], src_pos, axis=0)).astype(jnp.float32)

    out = encoder_pallas(x, key_pad, non_pad, params['stacked'], cfg)
    return out, non_pad


# ----------------------------------------------------------------------------
if __name__ == "__main__":
    cfg = dict(
        PAD=0,
        vocab_size=20,
        max_seq_len=32,
        encoder_dim=32,
        encoder_conv1d_filter_size=64,
        encoder_head=2,
        encoder_n_layer=2,
        dropout=0.1,         # no-op at inference
        conv_kernel=9,       # TODO(synk): hw_tts FFTBlock conv kernels assumed (9,1)/pad(4,0) per FastSpeech
        conv_pad=4,
    )

    key = jax.random.PRNGKey(0)
    k_seq, k_par = jax.random.split(key, 2)

    B, T = 2, 8
    src_seq = jax.random.randint(k_seq, (B, T), 1, cfg['vocab_size'])        # no PAD tokens
    src_pos = jnp.tile(jnp.arange(1, T + 1, dtype=jnp.int32)[None, :], (B, 1))

    params = init_params(k_par, cfg)

    enc_out, non_pad_mask = encoder_forward(src_seq, src_pos, params, cfg)
    jax.block_until_ready(enc_out)
    jax.block_until_ready(non_pad_mask)

    assert enc_out.shape == (B, T, cfg['encoder_dim'])
    assert non_pad_mask.shape == (B, T, 1)
    assert bool(jnp.all(jnp.isfinite(enc_out)))
    print("KERNEL_OK")
</pallas_src>

<mosaic_0001>
module attributes {stable_mosaic.version = 11 : i64} {
  func.func @kernel(%arg0: i32, %arg1: i32, %arg2: memref<1x8x32xf32, #tpu.memory_space<vmem>>, %arg3: memref<1x1x8xf32, #tpu.memory_space<vmem>>, %arg4: memref<1x8x1xf32, #tpu.memory_space<vmem>>, %arg5: memref<1x32x96xbf16, #tpu.memory_space<vmem>>, %arg6: memref<1x1x96xf32, #tpu.memory_space<vmem>>, %arg7: memref<1x2x16x32xbf16, #tpu.memory_space<vmem>>, %arg8: memref<1x1x32xf32, #tpu.memory_space<vmem>>, %arg9: memref<1x1x32xf32, #tpu.memory_space<vmem>>, %arg10: memref<1x1x32xf32, #tpu.memory_space<vmem>>, %arg11: memref<1x9x32x64xbf16, #tpu.memory_space<vmem>>, %arg12: memref<1x1x64xf32, #tpu.memory_space<vmem>>, %arg13: memref<1x64x32xbf16, #tpu.memory_space<vmem>>, %arg14: memref<1x1x32xf32, #tpu.memory_space<vmem>>, %arg15: memref<1x1x32xf32, #tpu.memory_space<vmem>>, %arg16: memref<1x1x32xf32, #tpu.memory_space<vmem>>, %arg17: memref<1x8x32xf32, #tpu.memory_space<vmem>>, %arg18: memref<8x32xf32, #tpu.memory_space<vmem>>, %arg19: memref<16x32xf32, #tpu.memory_space<vmem>>) attributes {dimension_semantics = [#tpu.dimension_semantics<parallel>, #tpu.dimension_semantics<arbitrary>], iteration_bounds = array<i64: 2, 2>, scalar_prefetch = 0 : i64, scratch_operands = 2 : i64, tpu.core_type = #tpu.core_type<tc>, window_params = [{transform_indices = @transform_0, window_bounds = array<i64: 1, 8, 32>}, {transform_indices = @transform_1, window_bounds = array<i64: 1, 1, 8>}, {transform_indices = @transform_2, window_bounds = array<i64: 1, 8, 1>}, {transform_indices = @transform_3, window_bounds = array<i64: 1, 32, 96>}, {transform_indices = @transform_4, window_bounds = array<i64: 1, 1, 96>}, {transform_indices = @transform_5, window_bounds = array<i64: 1, 2, 16, 32>}, {transform_indices = @transform_6, window_bounds = array<i64: 1, 1, 32>}, {transform_indices = @transform_7, window_bounds = array<i64: 1, 1, 32>}, {transform_indices = @transform_8, window_bounds = array<i64: 1, 1, 32>}, {transform_indices = @transform_9, window_bounds = array<i64: 1, 9, 32, 64>}, {transform_indices = @transform_10, window_bounds = array<i64: 1, 1, 64>}, {transform_indices = @transform_11, window_bounds = array<i64: 1, 64, 32>}, {transform_indices = @transform_12, window_bounds = array<i64: 1, 1, 32>}, {transform_indices = @transform_13, window_bounds = array<i64: 1, 1, 32>}, {transform_indices = @transform_14, window_bounds = array<i64: 1, 1, 32>}, {transform_indices = @transform_15, window_bounds = array<i64: 1, 8, 32>}]} {
    %c0_i32 = arith.constant 0 : i32
    %0 = arith.cmpi eq, %arg1, %c0_i32 : i32
    %1 = arith.extui %0 : i1 to i32
    %c0_i32_0 = arith.constant 0 : i32
    %2 = arith.cmpi ne, %1, %c0_i32_0 : i32
    scf.if %2 {
      %c0_134 = arith.constant 0 : index
      %c0_135 = arith.constant 0 : index
      %c0_136 = arith.constant 0 : index
      %206 = vector.load %arg2[%c0_134, %c0_135, %c0_136] : memref<1x8x32xf32, #tpu.memory_space<vmem>>, vector<1x8x32xf32>
      %207 = vector.shape_cast %206 : vector<1x8x32xf32> to vector<8x32xf32>
      %c0_137 = arith.constant 0 : index
      %c0_138 = arith.constant 0 : index
      %208 = vector.load %arg18[%c0_137, %c0_138] : memref<8x32xf32, #tpu.memory_space<vmem>>, vector<8x32xf32>
      tpu.vector_store %arg18[%c0_137, %c0_138], %207 {strides = array<i32>} : memref<8x32xf32, #tpu.memory_space<vmem>>, vector<8x32xf32>,
    } else {
    }
    %c0 = arith.constant 0 : index
    %c0_1 = arith.constant 0 : index
    %3 = vector.load %arg18[%c0, %c0_1] : memref<8x32xf32, #tpu.memory_space<vmem>>, vector<8x32xf32>
    %c0_2 = arith.constant 0 : index
    %c0_3 = arith.constant 0 : index
    %c0_4 = arith.constant 0 : index
    %4 = vector.load %arg3[%c0_2, %c0_3, %c0_4] : memref<1x1x8xf32, #tpu.memory_space<vmem>>, vector<1x1x8xf32>
    %5 = vector.shape_cast %4 : vector<1x1x8xf32> to vector<1x8xf32>
    %cst = arith.constant -1.000000e+09 : f32
    %6 = vector.broadcast %cst : f32 to vector<1x8xf32>
    %7 = arith.mulf %5, %6 : vector<1x8xf32>
    %c0_5 = arith.constant 0 : index
    %c0_6 = arith.constant 0 : index
    %c0_7 = arith.constant 0 : index
    %8 = vector.load %arg4[%c0_5, %c0_6, %c0_7] : memref<1x8x1xf32, #tpu.memory_space<vmem>>, vector<1x8x1xf32>
    %9 = vector.shape_cast %8 : vector<1x8x1xf32> to vector<8x1xf32>
    %10 = arith.truncf %3 : vector<8x32xf32> to vector<8x32xbf16>
    %c0_8 = arith.constant 0 : index
    %c0_9 = arith.constant 0 : index
    %c0_10 = arith.constant 0 : index
    %11 = vector.load %arg5[%c0_8, %c0_9, %c0_10] : memref<1x32x96xbf16, #tpu.memory_space<vmem>>, vector<1x32x96xbf16>
    %12 = vector.shape_cast %11 : vector<1x32x96xbf16> to vector<32x96xbf16>
    %cst_11 = arith.constant dense<0.000000e+00> : vector<8x96xf32>
    %13 = tpu.matmul %10, %12, %cst_11 {dimension_numbers = #tpu.dot_dimension_numbers<[1], [0], [0], [1], [0, 0, 1, 1], [], []>} : vector<8x32xbf16>, vector<32x96xbf16>, vector<8x96xf32> -> vector<8x96xf32>
    %c0_12 = arith.constant 0 : index
    %c0_13 = arith.constant 0 : index
    %c0_14 = arith.constant 0 : index
    %14 = vector.load %arg6[%c0_12, %c0_13, %c0_14] : memref<1x1x96xf32, #tpu.memory_space<vmem>>, vector<1x1x96xf32>
    %15 = vector.shape_cast %14 : vector<1x1x96xf32> to vector<1x96xf32>
    %16 = vector.broadcast %15 : vector<1x96xf32> to vector<8x96xf32>
    %17 = arith.addf %13, %16 : vector<8x96xf32>
    %18 = arith.truncf %17 : vector<8x96xf32> to vector<8x96xbf16>
    %c0_15 = arith.constant 0 : index
    %c0_16 = arith.constant 0 : index
    %c0_17 = arith.constant 0 : index
    %19 = vector.load %arg8[%c0_15, %c0_16, %c0_17] : memref<1x1x32xf32, #tpu.memory_space<vmem>>, vector<1x1x32xf32>
    %20 = vector.shape_cast %19 : vector<1x1x32xf32> to vector<1x32xf32>
    %21 = vector.shape_cast %20 : vector<1x32xf32> to vector<1x32xf32>
    %22 = vector.broadcast %21 : vector<1x32xf32> to vector<8x32xf32>
    %23 = vector.extract_strided_slice %18 {offsets = [0, 0], sizes = [8, 16], strides = [1, 1]} : vector<8x96xbf16> to vector<8x16xbf16>
    %24 = vector.extract_strided_slice %18 {offsets = [0, 32], sizes = [8, 16], strides = [1, 1]} : vector<8x96xbf16> to vector<8x16xbf16>
    %25 = vector.extract_strided_slice %18 {offsets = [0, 64], sizes = [8, 16], strides = [1, 1]} : vector<8x96xbf16> to vector<8x16xbf16>
    "tpu.trace_start"() <{level = 10 : i32, message = "qd,kd->qk"}> : () -> ()
    %cst_18 = arith.constant dense<0.000000e+00> : vector<8x8xf32>
    %26 = tpu.matmul %23, %24, %cst_18 {dimension_numbers = #tpu.dot_dimension_numbers<[1], [1], [0], [0], [0, 0, 1, 0], [], []>} : vector<8x16xbf16>, vector<8x16xbf16>, vector<8x8xf32> -> vector<8x8xf32>
    "tpu.trace_stop"() : () -> ()
    %cst_19 = arith.constant 2.500000e-01 : f32
    %27 = vector.broadcast %cst_19 : f32 to vector<8x8xf32>
    %28 = arith.mulf %26, %27 : vector<8x8xf32>
    %29 = vector.broadcast %7 : vector<1x8xf32> to vector<8x8xf32>
    %30 = arith.addf %28, %29 : vector<8x8xf32>
    %cst_20 = arith.constant dense<0xFF800000> : vector<8xf32>
    %31 = vector.multi_reduction <maximumf>, %30, %cst_20 [1] : vector<8x8xf32> to vector<8xf32>
    %32 = vector.shape_cast %31 : vector<8xf32> to vector<8x1xf32>
    %33 = vector.broadcast %32 : vector<8x1xf32> to vector<8x8xf32>
    %34 = arith.subf %30, %33 : vector<8x8xf32>
    %35 = math.exp %34 : vector<8x8xf32>
    %cst_21 = arith.constant dense<0.000000e+00> : vector<8xf32>
    %36 = vector.multi_reduction <add>, %35, %cst_21 [1] : vector<8x8xf32> to vector<8xf32>
    %37 = vector.shape_cast %36 : vector<8xf32> to vector<8x1xf32>
    %38 = tpu.reciprocal %37 {approx = true} : vector<8x1xf32> -> vector<8x1xf32>
    %39 = vector.broadcast %38 : vector<8x1xf32> to vector<8x8xf32>
    %40 = arith.mulf %35, %39 : vector<8x8xf32>
    %41 = arith.truncf %40 : vector<8x8xf32> to vector<8x8xbf16>
    %cst_22 = arith.constant dense<0.000000e+00> : vector<8x16xf32>
    %42 = tpu.matmul %41, %25, %cst_22 {dimension_numbers = #tpu.dot_dimension_numbers<[1], [0], [0], [1], [0, 0, 1, 1], [], []>} : vector<8x8xbf16>, vector<8x16xbf16>, vector<8x16xf32> -> vector<8x16xf32>
    %43 = arith.truncf %42 : vector<8x16xf32> to vector<8x16xbf16>
    %c0_23 = arith.constant 0 : index
    %c0_24 = arith.constant 0 : index
    %c0_25 = arith.constant 0 : index
    %c0_26 = arith.constant 0 : index
    %44 = vector.load %arg7[%c0_23, %c0_24, %c0_25, %c0_26] : memref<1x2x16x32xbf16, #tpu.memory_space<vmem>>, vector<1x1x16x32xbf16>
    %45 = vector.shape_cast %44 : vector<1x1x16x32xbf16> to vector<16x32xbf16>
    %cst_27 = arith.constant dense<0.000000e+00> : vector<8x32xf32>
    %46 = tpu.matmul %43, %45, %cst_27 {dimension_numbers = #tpu.dot_dimension_numbers<[1], [0], [0], [1], [0, 0, 1, 1], [], []>} : vector<8x16xbf16>, vector<16x32xbf16>, vector<8x32xf32> -> vector<8x32xf32>
    %47 = arith.addf %22, %46 : vector<8x32xf32>
    %48 = vector.extract_strided_slice %18 {offsets = [0, 16], sizes = [8, 16], strides = [1, 1]} : vector<8x96xbf16> to vector<8x16xbf16>
    %49 = vector.extract_strided_slice %18 {offsets = [0, 48], sizes = [8, 16], strides = [1, 1]} : vector<8x96xbf16> to vector<8x16xbf16>
    %50 = vector.extract_strided_slice %18 {offsets = [0, 80], sizes = [8, 16], strides = [1, 1]} : vector<8x96xbf16> to vector<8x16xbf16>
    "tpu.trace_start"() <{level = 10 : i32, message = "qd,kd->qk"}> : () -> ()
    %cst_28 = arith.constant dense<0.000000e+00> : vector<8x8xf32>
    %51 = tpu.matmul %48, %49, %cst_28 {dimension_numbers = #tpu.dot_dimension_numbers<[1], [1], [0], [0], [0, 0, 1, 0], [], []>} : vector<8x16xbf16>, vector<8x16xbf16>, vector<8x8xf32> -> vector<8x8xf32>
    "tpu.trace_stop"() : () -> ()
    %cst_29 = arith.constant 2.500000e-01 : f32
    %52 = vector.broadcast %cst_29 : f32 to vector<8x8xf32>
    %53 = arith.mulf %51, %52 : vector<8x8xf32>
    %54 = vector.broadcast %7 : vector<1x8xf32> to vector<8x8xf32>
    %55 = arith.addf %53, %54 : vector<8x8xf32>
    %cst_30 = arith.constant dense<0xFF800000> : vector<8xf32>
    %56 = vector.multi_reduction <maximumf>, %55, %cst_30 [1] : vector<8x8xf32> to vector<8xf32>
    %57 = vector.shape_cast %56 : vector<8xf32> to vector<8x1xf32>
    %58 = vector.broadcast %57 : vector<8x1xf32> to vector<8x8xf32>
    %59 = arith.subf %55, %58 : vector<8x8xf32>
    %60 = math.exp %59 : vector<8x8xf32>
    %cst_31 = arith.constant dense<0.000000e+00> : vector<8xf32>
    %61 = vector.multi_reduction <add>, %60, %cst_31 [1] : vector<8x8xf32> to vector<8xf32>
    %62 = vector.shape_cast %61 : vector<8xf32> to vector<8x1xf32>
    %63 = tpu.reciprocal %62 {approx = true} : vector<8x1xf32> -> vector<8x1xf32>
    %64 = vector.broadcast %63 : vector<8x1xf32> to vector<8x8xf32>
    %65 = arith.mulf %60, %64 : vector<8x8xf32>
    %66 = arith.truncf %65 : vector<8x8xf32> to vector<8x8xbf16>
    %cst_32 = arith.constant dense<0.000000e+00> : vector<8x16xf32>
    %67 = tpu.matmul %66, %50, %cst_32 {dimension_numbers = #tpu.dot_dimension_numbers<[1], [0], [0], [1], [0, 0, 1, 1], [], []>} : vector<8x8xbf16>, vector<8x16xbf16>, vector<8x16xf32> -> vector<8x16xf32>
    %68 = arith.truncf %67 : vector<8x16xf32> to vector<8x16xbf16>
    %c0_33 = arith.constant 0 : index
    %c1 = arith.constant 1 : index
    %c0_34 = arith.constant 0 : index
    %c0_35 = arith.constant 0 : index
    %69 = vector.load %arg7[%c0_33, %c1, %c0_34, %c0_35] : memref<1x2x16x32xbf16, #tpu.memory_space<vmem>>, vector<1x1x16x32xbf16>
    %70 = vector.shape_cast %69 : vector<1x1x16x32xbf16> to vector<16x32xbf16>
    %cst_36 = arith.constant dense<0.000000e+00> : vector<8x32xf32>
    %71 = tpu.matmul %68, %70, %cst_36 {dimension_numbers = #tpu.dot_dimension_numbers<[1], [0], [0], [1], [0, 0, 1, 1], [], []>} : vector<8x16xbf16>, vector<16x32xbf16>, vector<8x32xf32> -> vector<8x32xf32>
    %72 = arith.addf %47, %71 : vector<8x32xf32>
    %73 = arith.addf %72, %3 : vector<8x32xf32>
    %c0_37 = arith.constant 0 : index
    %c0_38 = arith.constant 0 : index
    %c0_39 = arith.constant 0 : index
    %74 = vector.load %arg9[%c0_37, %c0_38, %c0_39] : memref<1x1x32xf32, #tpu.memory_space<vmem>>, vector<1x1x32xf32>
    %75 = vector.shape_cast %74 : vector<1x1x32xf32> to vector<1x32xf32>
    %c0_40 = arith.constant 0 : index
    %c0_41 = arith.constant 0 : index
    %c0_42 = arith.constant 0 : index
    %76 = vector.load %arg10[%c0_40, %c0_41, %c0_42] : memref<1x1x32xf32, #tpu.memory_space<vmem>>, vector<1x1x32xf32>
    %77 = vector.shape_cast %76 : vector<1x1x32xf32> to vector<1x32xf32>
    %cst_43 = arith.constant dense<0.000000e+00> : vector<8xf32>
    %78 = vector.multi_reduction <add>, %73, %cst_43 [1] : vector<8x32xf32> to vector<8xf32>
    %79 = vector.shape_cast %78 : vector<8xf32> to vector<8x1xf32>
    %cst_44 = arith.constant 3.200000e+01 : f32
    %80 = vector.broadcast %cst_44 : f32 to vector<8x1xf32>
    %81 = arith.divf %79, %80 : vector<8x1xf32>
    %82 = vector.broadcast %81 : vector<8x1xf32> to vector<8x32xf32>
    %83 = arith.subf %73, %82 : vector<8x32xf32>
    %84 = arith.mulf %83, %83 : vector<8x32xf32>
    %cst_45 = arith.constant dense<0.000000e+00> : vector<8xf32>
    %85 = vector.multi_reduction <add>, %84, %cst_45 [1] : vector<8x32xf32> to vector<8xf32>
    %86 = vector.shape_cast %85 : vector<8xf32> to vector<8x1xf32>
    %cst_46 = arith.constant 3.200000e+01 : f32
    %87 = vector.broadcast %cst_46 : f32 to vector<8x1xf32>
    %88 = arith.divf %86, %87 : vector<8x1xf32>
    %89 = vector.broadcast %81 : vector<8x1xf32> to vector<8x32xf32>
    %90 = arith.subf %73, %89 : vector<8x32xf32>
    %cst_47 = arith.constant 9.99999974E-6 : f32
    %91 = vector.broadcast %cst_47 : f32 to vector<8x1xf32>
    %92 = arith.addf %88, %91 : vector<8x1xf32>
    %93 = math.rsqrt %92 : vector<8x1xf32>
    %94 = vector.broadcast %93 : vector<8x1xf32> to vector<8x32xf32>
    %95 = arith.mulf %90, %94 : vector<8x32xf32>
    %96 = vector.broadcast %75 : vector<1x32xf32> to vector<8x32xf32>
    %97 = arith.mulf %95, %96 : vector<8x32xf32>
    %98 = vector.broadcast %77 : vector<1x32xf32> to vector<8x32xf32>
    %99 = arith.addf %97, %98 : vector<8x32xf32>
    %100 = vector.broadcast %9 : vector<8x1xf32> to vector<8x32xf32>
    %101 = arith.mulf %99, %100 : vector<8x32xf32>
    %cst_48 = arith.constant 0.000000e+00 : f32
    %102 = vector.broadcast %cst_48 : f32 to vector<16x32xf32>
    %c0_49 = arith.constant 0 : index
    %c0_50 = arith.constant 0 : index
    %103 = vector.load %arg19[%c0_49, %c0_50] : memref<16x32xf32, #tpu.memory_space<vmem>>, vector<16x32xf32>
    tpu.vector_store %arg19[%c0_49, %c0_50], %102 {strides = array<i32>} : memref<16x32xf32, #tpu.memory_space<vmem>>, vector<16x32xf32>,
    %c4 = arith.constant 4 : index
    %c0_51 = arith.constant 0 : index
    %104 = vector.load %arg19[%c4, %c0_51] : memref<16x32xf32, #tpu.memory_space<vmem>>, vector<8x32xf32>
    tpu.vector_store %arg19[%c4, %c0_51], %101 {strides = array<i32>} : memref<16x32xf32, #tpu.memory_space<vmem>>, vector<8x32xf32>,
    %c0_52 = arith.constant 0 : index
    %c0_53 = arith.constant 0 : index
    %c0_54 = arith.constant 0 : index
    %105 = vector.load %arg12[%c0_52, %c0_53, %c0_54] : memref<1x1x64xf32, #tpu.memory_space<vmem>>, vector<1x1x64xf32>
    %106 = vector.shape_cast %105 : vector<1x1x64xf32> to vector<1x64xf32>
    %107 = vector.shape_cast %106 : vector<1x64xf32> to vector<1x64xf32>
    %108 = vector.broadcast %107 : vector<1x64xf32> to vector<8x64xf32>
    %c0_55 = arith.constant 0 : index
    %c0_56 = arith.constant 0 : index
    %109 = vector.load %arg19[%c0_55, %c0_56] : memref<16x32xf32, #tpu.memory_space<vmem>>, vector<8x32xf32>
    %110 = arith.truncf %109 : vector<8x32xf32> to vector<8x32xbf16>
    %c0_57 = arith.constant 0 : index
    %c0_58 = arith.constant 0 : index
    %c0_59 = arith.constant 0 : index
    %c0_60 = arith.constant 0 : index
    %111 = vector.load %arg11[%c0_57, %c0_58, %c0_59, %c0_60] : memref<1x9x32x64xbf16, #tpu.memory_space<vmem>>, vector<1x1x32x64xbf16>
    %112 = vector.shape_cast %111 : vector<1x1x32x64xbf16> to vector<32x64xbf16>
    %cst_61 = arith.constant dense<0.000000e+00> : vector<8x64xf32>
    %113 = tpu.matmul %110, %112, %cst_61 {dimension_numbers = #tpu.dot_dimension_numbers<[1], [0], [0], [1], [0, 0, 1, 1], [], []>} : vector<8x32xbf16>, vector<32x64xbf16>, vector<8x64xf32> -> vector<8x64xf32>
    %114 = arith.addf %108, %113 : vector<8x64xf32>
    %c1_62 = arith.constant 1 : index
    %c0_63 = arith.constant 0 : index
    %115 = vector.load %arg19[%c1_62, %c0_63] : memref<16x32xf32, #tpu.memory_space<vmem>>, vector<8x32xf32>
    %116 = arith.truncf %115 : vector<8x32xf32> to vector<8x32xbf16>
    %c0_64 = arith.constant 0 : index
    %c1_65 = arith.constant 1 : index
    %c0_66 = arith.constant 0 : index
    %c0_67 = arith.constant 0 : index
    %117 = vector.load %arg11[%c0_64, %c1_65, %c0_66, %c0_67] : memref<1x9x32x64xbf16, #tpu.memory_space<vmem>>, vector<1x1x32x64xbf16>
    %118 = vector.shape_cast %117 : vector<1x1x32x64xbf16> to vector<32x64xbf16>
    %cst_68 = arith.constant dense<0.000000e+00> : vector<8x64xf32>
    %119 = tpu.matmul %116, %118, %cst_68 {dimension_numbers = #tpu.dot_dimension_numbers<[1], [0], [0], [1], [0, 0, 1, 1], [], []>} : vector<8x32xbf16>, vector<32x64xbf16>, vector<8x64xf32> -> vector<8x64xf32>
    %120 = arith.addf %114, %119 : vector<8x64xf32>
    %c2 = arith.constant 2 : index
    %c0_69 = arith.constant 0 : index
    %121 = vector.load %arg19[%c2, %c0_69] : memref<16x32xf32, #tpu.memory_space<vmem>>, vector<8x32xf32>
    %122 = arith.truncf %121 : vector<8x32xf32> to vector<8x32xbf16>
    %c0_70 = arith.constant 0 : index
    %c2_71 = arith.constant 2 : index
    %c0_72 = arith.constant 0 : index
    %c0_73 = arith.constant 0 : index
    %123 = vector.load %arg11[%c0_70, %c2_71, %c0_72, %c0_73] : memref<1x9x32x64xbf16, #tpu.memory_space<vmem>>, vector<1x1x32x64xbf16>
    %124 = vector.shape_cast %123 : vector<1x1x32x64xbf16> to vector<32x64xbf16>
    %cst_74 = arith.constant dense<0.000000e+00> : vector<8x64xf32>
    %125 = tpu.matmul %122, %124, %cst_74 {dimension_numbers = #tpu.dot_dimension_numbers<[1], [0], [0], [1], [0, 0, 1, 1], [], []>} : vector<8x32xbf16>, vector<32x64xbf16>, vector<8x64xf32> -> vector<8x64xf32>
    %126 = arith.addf %120, %125 : vector<8x64xf32>
    %c3 = arith.constant 3 : index
    %c0_75 = arith.constant 0 : index
    %127 = vector.load %arg19[%c3, %c0_75] : memref<16x32xf32, #tpu.memory_space<vmem>>, vector<8x32xf32>
    %128 = arith.truncf %127 : vector<8x32xf32> to vector<8x32xbf16>
    %c0_76 = arith.constant 0 : index
    %c3_77 = arith.constant 3 : index
    %c0_78 = arith.constant 0 : index
    %c0_79 = arith.constant 0 : index
    %129 = vector.load %arg11[%c0_76, %c3_77, %c0_78, %c0_79] : memref<1x9x32x64xbf16, #tpu.memory_space<vmem>>, vector<1x1x32x64xbf16>
    %130 = vector.shape_cast %129 : vector<1x1x32x64xbf16> to vector<32x64xbf16>
    %cst_80 = arith.constant dense<0.000000e+00> : vector<8x64xf32>
    %131 = tpu.matmul %128, %130, %cst_80 {dimension_numbers = #tpu.dot_dimension_numbers<[1], [0], [0], [1], [0, 0, 1, 1], [], []>} : vector<8x32xbf16>, vector<32x64xbf16>, vector<8x64xf32> -> vector<8x64xf32>
    %132 = arith.addf %126, %131 : vector<8x64xf32>
    %c4_81 = arith.constant 4 : index
    %c0_82 = arith.constant 0 : index
    %133 = vector.load %arg19[%c4_81, %c0_82] : memref<16x32xf32, #tpu.memory_space<vmem>>, vector<8x32xf32>
    %134 = arith.truncf %133 : vector<8x32xf32> to vector<8x32xbf16>
    %c0_83 = arith.constant 0 : index
    %c4_84 = arith.constant 4 : index
    %c0_85 = arith.constant 0 : index
    %c0_86 = arith.constant 0 : index
    %135 = vector.load %arg11[%c0_83, %c4_84, %c0_85, %c0_86] : memref<1x9x32x64xbf16, #tpu.memory_space<vmem>>, vector<1x1x32x64xbf16>
    %136 = vector.shape_cast %135 : vector<1x1x32x64xbf16> to vector<32x64xbf16>
    %cst_87 = arith.constant dense<0.000000e+00> : vector<8x64xf32>
    %137 = tpu.matmul %134, %136, %cst_87 {dimension_numbers = #tpu.dot_dimension_numbers<[1], [0], [0], [1], [0, 0, 1, 1], [], []>} : vector<8x32xbf16>, vector<32x64xbf16>, vector<8x64xf32> -> vector<8x64xf32>
    %138 = arith.addf %132, %137 : vector<8x64xf32>
    %c5 = arith.constant 5 : index
    %c0_88 = arith.constant 0 : index
    %139 = vector.load %arg19[%c5, %c0_88] : memref<16x32xf32, #tpu.memory_space<vmem>>, vector<8x32xf32>
    %140 = arith.truncf %139 : vector<8x32xf32> to vector<8x32xbf16>
    %c0_89 = arith.constant 0 : index
    %c5_90 = arith.constant 5 : index
    %c0_91 = arith.constant 0 : index
    %c0_92 = arith.constant 0 : index
    %141 = vector.load %arg11[%c0_89, %c5_90, %c0_91, %c0_92] : memref<1x9x32x64xbf16, #tpu.memory_space<vmem>>, vector<1x1x32x64xbf16>
    %142 = vector.shape_cast %141 : vector<1x1x32x64xbf16> to vector<32x64xbf16>
    %cst_93 = arith.constant dense<0.000000e+00> : vector<8x64xf32>
    %143 = tpu.matmul %140, %142, %cst_93 {dimension_numbers = #tpu.dot_dimension_numbers<[1], [0], [0], [1], [0, 0, 1, 1], [], []>} : vector<8x32xbf16>, vector<32x64xbf16>, vector<8x64xf32> -> vector<8x64xf32>
    %144 = arith.addf %138, %143 : vector<8x64xf32>
    %c6 = arith.constant 6 : index
    %c0_94 = arith.constant 0 : index
    %145 = vector.load %arg19[%c6, %c0_94] : memref<16x32xf32, #tpu.memory_space<vmem>>, vector<8x32xf32>
    %146 = arith.truncf %145 : vector<8x32xf32> to vector<8x32xbf16>
    %c0_95 = arith.constant 0 : index
    %c6_96 = arith.constant 6 : index
    %c0_97 = arith.constant 0 : index
    %c0_98 = arith.constant 0 : index
    %147 = vector.load %arg11[%c0_95, %c6_96, %c0_97, %c0_98] : memref<1x9x32x64xbf16, #tpu.memory_space<vmem>>, vector<1x1x32x64xbf16>
    %148 = vector.shape_cast %147 : vector<1x1x32x64xbf16> to vector<32x64xbf16>
    %cst_99 = arith.constant dense<0.000000e+00> : vector<8x64xf32>
    %149 = tpu.matmul %146, %148, %cst_99 {dimension_numbers = #tpu.dot_dimension_numbers<[1], [0], [0], [1], [0, 0, 1, 1], [], []>} : vector<8x32xbf16>, vector<32x64xbf16>, vector<8x64xf32> -> vector<8x64xf32>
    %150 = arith.addf %144, %149 : vector<8x64xf32>
    %c7 = arith.constant 7 : index
    %c0_100 = arith.constant 0 : index
    %151 = vector.load %arg19[%c7, %c0_100] : memref<16x32xf32, #tpu.memory_space<vmem>>, vector<8x32xf32>
    %152 = arith.truncf %151 : vector<8x32xf32> to vector<8x32xbf16>
    %c0_101 = arith.constant 0 : index
    %c7_102 = arith.constant 7 : index
    %c0_103 = arith.constant 0 : index
    %c0_104 = arith.constant 0 : index
    %153 = vector.load %arg11[%c0_101, %c7_102, %c0_103, %c0_104] : memref<1x9x32x64xbf16, #tpu.memory_space<vmem>>, vector<1x1x32x64xbf16>
    %154 = vector.shape_cast %153 : vector<1x1x32x64xbf16> to vector<32x64xbf16>
    %cst_105 = arith.constant dense<0.000000e+00> : vector<8x64xf32>
    %155 = tpu.matmul %152, %154, %cst_105 {dimension_numbers = #tpu.dot_dimension_numbers<[1], [0], [0], [1], [0, 0, 1, 1], [], []>} : vector<8x32xbf16>, vector<32x64xbf16>, vector<8x64xf32> -> vector<8x64xf32>
    %156 = arith.addf %150, %155 : vector<8x64xf32>
    %c8 = arith.constant 8 : index
    %c0_106 = arith.constant 0 : index
    %157 = vector.load %arg19[%c8, %c0_106] : memref<16x32xf32, #tpu.memory_space<vmem>>, vector<8x32xf32>
    %158 = arith.truncf %157 : vector<8x32xf32> to vector<8x32xbf16>
    %c0_107 = arith.constant 0 : index
    %c8_108 = arith.constant 8 : index
    %c0_109 = arith.constant 0 : index
    %c0_110 = arith.constant 0 : index
    %159 = vector.load %arg11[%c0_107, %c8_108, %c0_109, %c0_110] : memref<1x9x32x64xbf16, #tpu.memory_space<vmem>>, vector<1x1x32x64xbf16>
    %160 = vector.shape_cast %159 : vector<1x1x32x64xbf16> to vector<32x64xbf16>
    %cst_111 = arith.constant dense<0.000000e+00> : vector<8x64xf32>
    %161 = tpu.matmul %158, %160, %cst_111 {dimension_numbers = #tpu.dot_dimension_numbers<[1], [0], [0], [1], [0, 0, 1, 1], [], []>} : vector<8x32xbf16>, vector<32x64xbf16>, vector<8x64xf32> -> vector<8x64xf32>
    %162 = arith.addf %156, %161 : vector<8x64xf32>
    %cst_112 = arith.constant 0.000000e+00 : f32
    %163 = vector.broadcast %cst_112 : f32 to vector<8x64xf32>
    %164 = arith.maximumf %162, %163 : vector<8x64xf32>
    %165 = arith.truncf %164 : vector<8x64xf32> to vector<8x64xbf16>
    %c0_113 = arith.constant 0 : index
    %c0_114 = arith.constant 0 : index
    %c0_115 = arith.constant 0 : index
    %166 = vector.load %arg13[%c0_113, %c0_114, %c0_115] : memref<1x64x32xbf16, #tpu.memory_space<vmem>>, vector<1x64x32xbf16>
    %167 = vector.shape_cast %166 : vector<1x64x32xbf16> to vector<64x32xbf16>
    %cst_116 = arith.constant dense<0.000000e+00> : vector<8x32xf32>
    %168 = tpu.matmul %165, %167, %cst_116 {dimension_numbers = #tpu.dot_dimension_numbers<[1], [0], [0], [1], [0, 0, 1, 1], [], []>} : vector<8x64xbf16>, vector<64x32xbf16>, vector<8x32xf32> -> vector<8x32xf32>
    %c0_117 = arith.constant 0 : index
    %c0_118 = arith.constant 0 : index
    %c0_119 = arith.constant 0 : index
    %169 = vector.load %arg14[%c0_117, %c0_118, %c0_119] : memref<1x1x32xf32, #tpu.memory_space<vmem>>, vector<1x1x32xf32>
    %170 = vector.shape_cast %169 : vector<1x1x32xf32> to vector<1x32xf32>
    %171 = vector.broadcast %170 : vector<1x32xf32> to vector<8x32xf32>
    %172 = arith.addf %168, %171 : vector<8x32xf32>
    %173 = arith.addf %172, %101 : vector<8x32xf32>
    %c0_120 = arith.constant 0 : index
    %c0_121 = arith.constant 0 : index
    %c0_122 = arith.constant 0 : index
    %174 = vector.load %arg15[%c0_120, %c0_121, %c0_122] : memref<1x1x32xf32, #tpu.memory_space<vmem>>, vector<1x1x32xf32>
    %175 = vector.shape_cast %174 : vector<1x1x32xf32> to vector<1x32xf32>
    %c0_123 = arith.constant 0 : index
    %c0_124 = arith.constant 0 : index
    %c0_125 = arith.constant 0 : index
    %176 = vector.load %arg16[%c0_123, %c0_124, %c0_125] : memref<1x1x32xf32, #tpu.memory_space<vmem>>, vector<1x1x32xf32>
    %177 = vector.shape_cast %176 : vector<1x1x32xf32> to vector<1x32xf32>
    %cst_126 = arith.constant dense<0.000000e+00> : vector<8xf32>
    %178 = vector.multi_reduction <add>, %173, %cst_126 [1] : vector<8x32xf32> to vector<8xf32>
    %179 = vector.shape_cast %178 : vector<8xf32> to vector<8x1xf32>
    %cst_127 = arith.constant 3.200000e+01 : f32
    %180 = vector.broadcast %cst_127 : f32 to vector<8x1xf32>
    %181 = arith.divf %179, %180 : vector<8x1xf32>
    %182 = vector.broadcast %181 : vector<8x1xf32> to vector<8x32xf32>
    %183 = arith.subf %173, %182 : vector<8x32xf32>
    %184 = arith.mulf %183, %183 : vector<8x32xf32>
    %cst_128 = arith.constant dense<0.000000e+00> : vector<8xf32>
    %185 = vector.multi_reduction <add>, %184, %cst_128 [1] : vector<8x32xf32> to vector<8xf32>
    %186 = vector.shape_cast %185 : vector<8xf32> to vector<8x1xf32>
    %cst_129 = arith.constant 3.200000e+01 : f32
    %187 = vector.broadcast %cst_129 : f32 to vector<8x1xf32>
    %188 = arith.divf %186, %187 : vector<8x1xf32>
    %189 = vector.broadcast %181 : vector<8x1xf32> to vector<8x32xf32>
    %190 = arith.subf %173, %189 : vector<8x32xf32>
    %cst_130 = arith.constant 9.99999974E-6 : f32
    %191 = vector.broadcast %cst_130 : f32 to vector<8x1xf32>
    %192 = arith.addf %188, %191 : vector<8x1xf32>
    %193 = math.rsqrt %192 : vector<8x1xf32>
    %194 = vector.broadcast %193 : vector<8x1xf32> to vector<8x32xf32>
    %195 = arith.mulf %190, %194 : vector<8x32xf32>
    %196 = vector.broadcast %175 : vector<1x32xf32> to vector<8x32xf32>
    %197 = arith.mulf %195, %196 : vector<8x32xf32>
    %198 = vector.broadcast %177 : vector<1x32xf32> to vector<8x32xf32>
    %199 = arith.addf %197, %198 : vector<8x32xf32>
    %200 = vector.broadcast %9 : vector<8x1xf32> to vector<8x32xf32>
    %201 = arith.mulf %199, %200 : vector<8x32xf32>
    %c0_131 = arith.constant 0 : index
    %c0_132 = arith.constant 0 : index
    %202 = vector.load %arg18[%c0_131, %c0_132] : memref<8x32xf32, #tpu.memory_space<vmem>>, vector<8x32xf32>
    tpu.vector_store %arg18[%c0_131, %c0_132], %201 {strides = array<i32>} : memref<8x32xf32, #tpu.memory_space<vmem>>, vector<8x32xf32>,
    %c1_i32 = arith.constant 1 : i32
    %203 = arith.cmpi eq, %arg1, %c1_i32 : i32
    %204 = arith.extui %203 : i1 to i32
    %c0_i32_133 = arith.constant 0 : i32
    %205 = arith.cmpi ne, %204, %c0_i32_133 : i32
    scf.if %205 {
      %c0_134 = arith.constant 0 : index
      %c0_135 = arith.constant 0 : index
      %c0_136 = arith.constant 0 : index
      %206 = vector.load %arg17[%c0_134, %c0_135, %c0_136] : memref<1x8x32xf32, #tpu.memory_space<vmem>>, vector<1x8x32xf32>
      %207 = vector.shape_cast %206 : vector<1x8x32xf32> to vector<8x32xf32>
      %208 = vector.shape_cast %201 : vector<8x32xf32> to vector<1x8x32xf32>
      tpu.vector_store %arg17[%c0_134, %c0_135, %c0_136], %208 {strides = array<i32>} : memref<1x8x32xf32, #tpu.memory_space<vmem>>, vector<1x8x32xf32>,
    } else {
    }
    return
  }
  func.func @transform_0(%arg0: i32, %arg1: i32) -> (i32, i32, i32) {
    %c0_i32 = arith.constant 0 : i32
    %c0_i32_0 = arith.constant 0 : i32
    %c0_i32_1 = arith.constant 0 : i32
    return %arg0, %c0_i32, %c0_i32_0 : i32, i32, i32
  }
  func.func @transform_1(%arg0: i32, %arg1: i32) -> (i32, i32, i32) {
    %c0_i32 = arith.constant 0 : i32
    %c0_i32_0 = arith.constant 0 : i32
    %c0_i32_1 = arith.constant 0 : i32
    return %arg0, %c0_i32, %c0_i32_0 : i32, i32, i32
  }
  func.func @transform_2(%arg0: i32, %arg1: i32) -> (i32, i32, i32) {
    %c0_i32 = arith.constant 0 : i32
    %c0_i32_0 = arith.constant 0 : i32
    %c0_i32_1 = arith.constant 0 : i32
    return %arg0, %c0_i32, %c0_i32_0 : i32, i32, i32
  }
  func.func @transform_3(%arg0: i32, %arg1: i32) -> (i32, i32, i32) {
    %c0_i32 = arith.constant 0 : i32
    %c0_i32_0 = arith.constant 0 : i32
    %c0_i32_1 = arith.constant 0 : i32
    return %arg1, %c0_i32, %c0_i32_0 : i32, i32, i32
  }
  func.func @transform_4(%arg0: i32, %arg1: i32) -> (i32, i32, i32) {
    %c0_i32 = arith.constant 0 : i32
    %c0_i32_0 = arith.constant 0 : i32
    %c0_i32_1 = arith.constant 0 : i32
    return %arg1, %c0_i32, %c0_i32_0 : i32, i32, i32
  }
  func.func @transform_5(%arg0: i32, %arg1: i32) -> (i32, i32, i32, i32) {
    %c0_i32 = arith.constant 0 : i32
    %c0_i32_0 = arith.constant 0 : i32
    %c0_i32_1 = arith.constant 0 : i32
    %c0_i32_2 = arith.constant 0 : i32
    return %arg1, %c0_i32, %c0_i32_0, %c0_i32_1 : i32, i32, i32, i32
  }
  func.func @transform_6(%arg0: i32, %arg1: i32) -> (i32, i32, i32) {
    %c0_i32 = arith.constant 0 : i32
    %c0_i32_0 = arith.constant 0 : i32
    %c0_i32_1 = arith.constant 0 : i32
    return %arg1, %c0_i32, %c0_i32_0 : i32, i32, i32
  }
  func.func @transform_7(%arg0: i32, %arg1: i32) -> (i32, i32, i32) {
    %c0_i32 = arith.constant 0 : i32
    %c0_i32_0 = arith.constant 0 : i32
    %c0_i32_1 = arith.constant 0 : i32
    return %arg1, %c0_i32, %c0_i32_0 : i32, i32, i32
  }
  func.func @transform_8(%arg0: i32, %arg1: i32) -> (i32, i32, i32) {
    %c0_i32 = arith.constant 0 : i32
    %c0_i32_0 = arith.constant 0 : i32
    %c0_i32_1 = arith.constant 0 : i32
    return %arg1, %c0_i32, %c0_i32_0 : i32, i32, i32
  }
  func.func @transform_9(%arg0: i32, %arg1: i32) -> (i32, i32, i32, i32) {
    %c0_i32 = arith.constant 0 : i32
    %c0_i32_0 = arith.constant 0 : i32
    %c0_i32_1 = arith.constant 0 : i32
    %c0_i32_2 = arith.constant 0 : i32
    return %arg1, %c0_i32, %c0_i32_0, %c0_i32_1 : i32, i32, i32, i32
  }
  func.func @transform_10(%arg0: i32, %arg1: i32) -> (i32, i32, i32) {
    %c0_i32 = arith.constant 0 : i32
    %c0_i32_0 = arith.constant 0 : i32
    %c0_i32_1 = arith.constant 0 : i32
    return %arg1, %c0_i32, %c0_i32_0 : i32, i32, i32
  }
  func.func @transform_11(%arg0: i32, %arg1: i32) -> (i32, i32, i32) {
    %c0_i32 = arith.constant 0 : i32
    %c0_i32_0 = arith.constant 0 : i32
    %c0_i32_1 = arith.constant 0 : i32
    return %arg1, %c0_i32, %c0_i32_0 : i32, i32, i32
  }
  func.func @transform_12(%arg0: i32, %arg1: i32) -> (i32, i32, i32) {
    %c0_i32 = arith.constant 0 : i32
    %c0_i32_0 = arith.constant 0 : i32
    %c0_i32_1 = arith.constant 0 : i32
    return %arg1, %c0_i32, %c0_i32_0 : i32, i32, i32
  }
  func.func @transform_13(%arg0: i32, %arg1: i32) -> (i32, i32, i32) {
    %c0_i32 = arith.constant 0 : i32
    %c0_i32_0 = arith.constant 0 : i32
    %c0_i32_1 = arith.constant 0 : i32
    return %arg1, %c0_i32, %c0_i32_0 : i32, i32, i32
  }
  func.func @transform_14(%arg0: i32, %arg1: i32) -> (i32, i32, i32) {
    %c0_i32 = arith.constant 0 : i32
    %c0_i32_0 = arith.constant 0 : i32
    %c0_i32_1 = arith.constant 0 : i32
    return %arg1, %c0_i32, %c0_i32_0 : i32, i32, i32
  }
  func.func @transform_15(%arg0: i32, %arg1: i32) -> (i32, i32, i32) {
    %c0_i32 = arith.constant 0 : i32
    %c0_i32_0 = arith.constant 0 : i32
    %c0_i32_1 = arith.constant 0 : i32
    return %arg0, %c0_i32, %c0_i32_0 : i32, i32, i32
  }
}

</mosaic_0001>

<bundles_post_ra>
// kernel: tpu_custom_call.1
= control target key start
LH: loop header
LB: loop body
LE: loop exit
PB: predicated region body
PF: predicated region fallthrough
CT: control target
= control target key end

     0   :  { %s3344_s0 = inlined_call_operand.vmem [shape: f32[2,8,32], index: 0, kind: input, shape index: {}]   ;;  %s3345_s1 = inlined_call_operand.vmem [shape: f32[2,1,8], index: 1, kind: input, shape index: {}]   ;;  %s3346_s2 = inlined_call_operand.vmem [shape: f32[2,8,1], index: 2, kind: input, shape index: {}]   ;;  %s3347_s3 = inlined_call_operand.vmem [shape: bf16[2,32,96], index: 3, kind: input, shape index: {}]   ;;  %s3348_s4 = inlined_call_operand.vmem [shape: f32[2,1,96], index: 4, kind: input, shape index: {}]   ;;  %s3349_s5 = inlined_call_operand.vmem [shape: bf16[2,2,16,32], index: 5, kind: input, shape index: {}]   ;;  %s3350_s6 = inlined_call_operand.vmem [shape: f32[2,1,32], index: 6, kind: input, shape index: {}]   ;;  %s3351_s7 = inlined_call_operand.vmem [shape: f32[2,1,32], index: 7, kind: input, shape index: {}]   ;;  %s3352_s8 = inlined_call_operand.vmem [shape: f32[2,1,32], index: 8, kind: input, shape index: {}]   ;;  %s3353_s9 = inlined_call_operand.hbm [shape: bf16[2,9,32,64], index: 9, kind: input, shape index: {}]   ;;  %s3354_s10 = inlined_call_operand.vmem [shape: f32[2,1,64], index: 10, kind: input, shape index: {}]   ;;  %s3355_s11 = inlined_call_operand.vmem [shape: bf16[2,64,32], index: 11, kind: input, shape index: {}]   ;;  %s3356_s12 = inlined_call_operand.vmem [shape: f32[2,1,32], index: 12, kind: input, shape index: {}]   ;;  %s3357_s13 = inlined_call_operand.vmem [shape: f32[2,1,32], index: 13, kind: input, shape index: {}]   ;;  %s3358_s14 = inlined_call_operand.vmem [shape: f32[2,1,32], index: 14, kind: input, shape index: {}]   ;;  %s3359_s15 = inlined_call_operand.hbm [shape: f32[2,8,32], index: 15, kind: output, shape index: {}]  }
   0x1   :  { %3379 = sst [smem:[#allocation27_spill]] %s3344_s0 }
   0x2   :  { %3380 = sst [smem:[#allocation28_spill]] %s3346_s2 }
   0x3   :  { %3381 = sst [smem:[#allocation29_spill]] %s3347_s3 }
   0x4   :  { %3382 = sst [smem:[#allocation30_spill]] %s3349_s5 }
   0x5   :  { %3383 = sst [smem:[#allocation31_spill]] %s3351_s7 }
   0x6   :  { %3384 = sst [smem:[#allocation32_spill]] %s3352_s8 }
   0x7   :  { %3385 = sst [smem:[#allocation33_spill]] %s3353_s9 }
   0x8   :  { %3386 = sst [smem:[#allocation34_spill]] %s3354_s10 }
   0x9   :  { %3387 = sst [smem:[#allocation35_spill]] %s3355_s11 }
   0xa   :  { %3388 = sst [smem:[#allocation36_spill]] %s3356_s12 }
   0xb   :  { %3389 = sst [smem:[#allocation37_spill]] %s3357_s13 }
   0xc   :  { %3390 = sst [smem:[#allocation38_spill]] %s3358_s14 }
   0xd   :  { %3391 = sst [smem:[#allocation39_spill]] %s3359_s15 }
   0xe   :  { %20 = vsyncpa [#allocation5], 0 }
   0xf   :  { %22 = vsyncpa [#allocation5 + $0x1], 0 }
  0x10   :  { %23 = vsyncpa [#allocation6], 0 }
  0x11   :  { %25 = vsyncpa [#allocation6 + $0x1], 0  ;;  %s2861_s18 = smov 0   ;;  %s2863_s19 = smov 0  }
  0x12   :  { %s2865_s20 = smov 0   ;;  %s2867_s21 = smov 0  }
  0x13   :  { %s2869_s22 = smov 0   ;;  %s2871_s23 = smov 0  }
  0x14   :  { %s2873_s24 = smov 0   ;;  %s2875_s25 = smov 0  }
  0x15   :  { %s2877_s26 = smov 0   ;;  %s2879_s27 = smov 0  }
  0x16   :  { %s2881_s28 = smov 0  }
  0x17 LB: > { %3392 = sst [smem:[#allocation10_spill]] %s2727_s18  ;;  %s2143_s29 = sadd.s32 4294967295, %s2767_s28   ;;  %s2767_s28 = sphi %s2881_s28, %s31_s28   ;;  %s2763_s27 = sphi %s2879_s27, %s3458_s27   ;;  %s2759_s26 = sphi %s2877_s26, %s3457_s26   ;;  %s2755_s25 = sphi %s2875_s25, %s3456_s25   ;;  %s2751_s24 = sphi %s2873_s24, %s3455_s24   ;;  %s2747_s23 = sphi %s2871_s23, %s3454_s23   ;;  %s2743_s22 = sphi %s2869_s22, %s3453_s22   ;;  %s2739_s21 = sphi %s2867_s21, %s3452_s21   ;;  %s2735_s20 = sphi %s2865_s20, %s3451_s20   ;;  %s2731_s19 = sphi %s2863_s19, %s3450_s19   ;;  %s2727_s18 = sphi %s2861_s18, %s3449_s18  }
  0x18   : > { %3393 = sst [smem:[#allocation11_spill]] %s2731_s19  ;;  %s2144_s30 = sadd.s32 4294967294, %s2767_s28  }
  0x19   : > { %3394 = sst [smem:[#allocation12_spill]] %s2735_s20  ;;  %s40_s16 = sadd.s32 1, %s2759_s26 }
  0x1a   : > { %3395 = sst [smem:[#allocation13_spill]] %s2743_s22  ;;  %s43_s17 = sadd.s32 1, %s2763_s27 }
  0x1b   : > { %3396 = sst [smem:[#allocation14_spill]] %s2747_s23  ;;  %p41_p0 = scmp.ge.s32.totalorder %s40_s16, 2 }
  0x1c   : > { %3397 = sst [smem:[#allocation15_spill]] %s2755_s25  ;;  %s284_s15 = sadd.s32 1, %s2747_s23 }
  0x1d   : > { %3398 = sst [smem:[#allocation16_spill]] %s2759_s26  ;;  %p291_p1 = scmp.ne.s32.totalorder %s2747_s23, %s2743_s22 }
  0x1e   : > { %3399 = sst [smem:[#allocation17_spill]] %s2763_s27  ;;  %p292_p2 = scmp.eq.s32.totalorder %s2767_s28, 0 }
  0x1f   : > { %3400 = sst [smem:[#allocation18_spill]] %s2767_s28  ;;  %s3460_s16 = smov (%p41_p0, %s40_s16), 0 }
  0x20   : > { %3401 = sst [smem:[#allocation19_spill]] %s3460_s16  ;;  %s3462_s17 = smov (!%p41_p0, %s43_s17), %s2763_s27 }
  0x21   : > { %s281_s14 = ssub.s32 %s2759_s26, %s3460_s16  ;;  %p2927_p3 = por %p292_p2, %p291_p1 }
  0x22   : > { %p45_p4 = scmp.ge.s32.totalorder %s3462_s17, 2  ;;  %p282_p5 = scmp.eq.s32.totalorder %s281_s14, 0 }
  0x23   : > { %p297_p6 = scmp.ne.s32.totalorder %s2743_s22, %s2739_s21  ;;  %p298_p7 = scmp.eq.s32.totalorder %s2143_s29, 0 }
  0x24   : > { %s3464_s17 = smov (%p45_p4, %s3462_s17), 0  ;;  %s440_s10 = sadd.s32 1, %s2735_s20 }
  0x25   : > { %3403 = sst [smem:[#allocation20_spill]] %s3464_s17  ;;  %p2937_p8 = por %p298_p7, %p297_p6 }
  0x26   : > { %s2935_s11 = scalar_select %p282_p5, %s2747_s23, %s284_s15  }
  0x27   : > { %s437_s12 = ssub.s32 %s2763_s27, %s3464_s17  ;;  %p450_p10 = scmp.ne.s32.totalorder %s2735_s20, %s2731_s19 }
  0x28   : > { %3404 = sst [smem:[#allocation21_spill]] %s2935_s11  ;;  %p438_p9 = scmp.eq.s32.totalorder %s437_s12, 0 }
  0x29   : > { %p451_p11 = scmp.eq.s32.totalorder %s2143_s29, 3  ;;  %p456_p13 = scmp.ne.s32.totalorder %s2731_s19, %s2727_s18 }
  0x2a   : > { %s2947_s14 = scalar_select %p438_p9, %s2735_s20, %s440_s10  }
  0x2b   : > { %p2949_p12 = por %p451_p11, %p450_p10  ;;  %p457_p0 = scmp.eq.s32.totalorder %s2144_s30, 3 }
  0x2c   : > { %3406 = sst [smem:[#allocation22_spill]] %s2947_s14  ;;  %p2475_p1 = scmp.lt.s32.totalorder %s2767_s28, 4 }
  0x2d   : > { %s3407_s21 = scalar_select %p2949_p12, 1, 0 }
  0x2e   : > { %s537_s15 = sand.u32 1, %s2747_s23   ;;  %p2957_p2 = por %p457_p0, %p456_p13 }
  0x2f   : > { %3408 = sst [smem:[#allocation23_spill]] %s3407_s21  ;;  %s2460_s8 = smul.u32 144, %s537_s15 }
  0x30   : > { %s3409_s11 = scalar_select %p2957_p2, 1, 0 }
  0x31   : > { %p2963_p4 = pnand %p2475_p1, %p2927_p3  ;;  %s2461_s10 = smul.u32 2304, %s2759_s26 }
  0x32   : > { %3410 = sst [smem:[#allocation24_spill]] %s3409_s11  ;;  %s3412_s9 = sld [smem:[#allocation33_spill]] }
  0x33   : > { %s541_s30 = scalar_lea.vmem [#allocation4], %s2460_s8  ;;  %s2975_s13 = scalar_lea.sflag [#allocation5], %s537_s15 }
  0x34   : > { %s548_s23 = sshll.u32 %s541_s30, 4  ;;  %p2617_p5 = pneg %p2963_p4  ;;  %s2973_s23 = int_to_ptr.vmem [resolvable:$true] %s548_s23 }
  0x38   : > { %s2971_s27 = scalar_lea.hbm %s3412_s9, %s2461_s10  ;;  %s2620_s29 = scalar_lea.hbm %s3412_s9, 4608 }
  0x39   : > { %s2615_s14 = scalar_lea.hbm %s2971_s27, 2304  ;;  %p2621_p9 = scmp.lt.u32.totalorder %s2971_s27, %s3412_s9 }
  0x3a   : > { %p2616_p3 = scmp.ne.s32.totalorder %s2971_s27, %s2615_s14  ;;  %p2622_p10 = scmp.lt.u32.totalorder %s2620_s29, %s2615_s14 }
  0x3b   : > { %p2624_p13 = scmp.lt.u32.totalorder %s2615_s14, %s2971_s27 }
  0x3c   : > { %p2618_p6 = pnand %p2617_p5, %p2616_p3  ;;  %p2623_p11 = por %p2622_p10, %p2621_p9 }
  0x3e   : > { %p2619_p7 = pneg %p2618_p6  ;;  %p2625_p0 = por %p2624_p13, %p2623_p11 }
  0x40   : > { %p2626_p1 = pnand %p2625_p0, %p2619_p7 }
  0x42   : > { %2629 = shalt.err (!%p2626_p1)
}
  0x43   : > { %s2630_s8 = scalar_lea.vmem %s2973_s23, 2304  ;;  %s2769_s15 = smov [#allocation4]  }
  0x44   : > { %p2631_p3 = scmp.ne.s32.totalorder %s2973_s23, %s2630_s8  ;;  %s2635_s30 = sshll.u32 %s2769_s15, 4  ;;  %s2636_s30 = int_to_ptr.vmem [resolvable:$false] %s2635_s30 }
  0x45   : > { %s2637_s20 = scalar_lea.vmem %s2636_s30, 4608  ;;  %p2638_p12 = scmp.lt.s32.totalorder %s2973_s23, %s2636_s30 }
  0x46   : > { %p2633_p6 = pnand %p2631_p3, %p2617_p5  ;;  %p2639_p9 = scmp.lt.s32.totalorder %s2637_s20, %s2630_s8 }
  0x48   : > { %p2634_p2 = pneg %p2633_p6  ;;  %p2640_p10 = por %p2639_p9, %p2638_p12 }
  0x4a   : > { %p2641_p11 = pnand %p2640_p10, %p2634_p2 }
  0x4c   : > { %2644 = shalt.err (!%p2641_p11)
}
  0x4d   : > { %s2770_s26 = smov 64   ;;  %s2771_s14 = smov 4  }
  0x4e   : > { %2470 = dma.hbm_to_vmem [thread:$0]  (!%p2963_p4), %s2971_s27, 2304, %s2973_s23, %s2975_s13, %s2770_s26, %s2770_s26, %s2771_s14  }
  0x4f   : > { %p2148_p5 = scmp.ge.s32.totalorder %s2767_s28, 1  ;;  %p588_p7 = scmp.lt.s32.totalorder %s2767_s28, 5 }
  0x51   : > { %p589_p13 = pnand %p2148_p5, %p588_p7 }
  0x53   : > { %592 = sbr.rel (%p589_p13) target bundleno = 3382 (0xd36), region = 80 }
  0x5a   : > { %s594_s17 = sand.u32 1, %s2743_s22  }
  0x5b   : > { %s2462_s10 = smul.u32 144, %s594_s17  ;;  %s595_s29 = scalar_lea.sflag [#allocation5], %s594_s17 }
  0x5d   : > { %s3006_s8 = scalar_lea.vmem [#allocation4], %s2462_s10 }
  0x5e   : > { %3413 = sst [smem:[#allocation25_spill]] %s3006_s8 }
  0x5f   : > { %2718 = dma.done.wait (%p2937_p8), %s595_s29, 2304  }
  0x60   : > { %2720 = vsyncadd (%p2937_p8), %s595_s29, 4294964992  ;;  %s3368_s23 = sand.u32 1, %s2731_s19   ;;  %p695_p12 = scmp.lt.s32.totalorder %s2755_s25, 1 }
  0x61   : > { %s3016_s27 = sshll.u32 %s3368_s23, 3  ;;  %p706_p2 = scmp.lt.s32.totalorder %s2751_s24, 1 }
  0x62   : > { %s3020_s12 = scalar_select %p695_p12, %s2755_s25, 1 }
  0x63   : > { %s3023_s13 = scalar_select %p706_p2, %s2751_s24, 1 }
  0x64   : > { %s2150_s16 = sshll.u32 %s3020_s12, 3  ;;  %s3414_s0 = sld [smem:[#allocation27_spill]] }
  0x65   : > { %s3415_s2 = sld [smem:[#allocation28_spill]]  ;;  %s2249_s9 = sshll.u32 %s3023_s13, 4 }
  0x66   : > { %s3417_s3 = sld [smem:[#allocation29_spill]]  ;;  %s3418_s5 = sld [smem:[#allocation30_spill]] }
  0x67   : > { %s3421_s21 = sld [smem:[#allocation34_spill]]  ;;  %s2251_s8 = sshll.u32 %s3023_s13, 5 }
  0x68   : > { %s3422_s30 = sld [smem:[#allocation36_spill]]  ;;  %s3423_s14 = sld [smem:[#allocation35_spill]] }
  0x69   : > { %s3425_s22 = sld [smem:[#allocation38_spill]]  ;;  %s694_s25 = scalar_lea.vmem [#allocation7], %s3016_s27 }
  0x6a   : > { %s698_s17 = scalar_lea.vmem %s3414_s0, %s2150_s16  ;;  %p2158_p8 = scmp.ne.s32.totalorder %s2751_s24, 0 }
  0x6b   : > { %s3036_s23 = scalar_lea.vmem %s3415_s2, %s2150_s16  ;;  %s3424_s2 = sld [smem:[#allocation37_spill]]  ;;  %v750_v0 = vld [vmem:[%s698_s17] sm:$0xff] (!%p2158_p8)  ;;  %vm751_vm0 = vcmask (!%p2158_p8), 261120  }
  0x6c   : > { %3416 = sst [smem:[#allocation26_spill]] %s3036_s23  ;;  %s710_s15 = scalar_lea.vmem %s3417_s3, %s2249_s9  ;;  %752 = vst.msk [vmem:[#allocation2] sm:$0xff] (!%p2158_p8), %vm751_vm0, %v750_v0 }
  0x6d   : > { %s3049_s26 = scalar_lea.vmem %s3418_s5, %s2249_s9  ;;  %s730_s3 = scalar_lea.vmem %s3421_s21, %s3023_s13 }
  0x6e   : > { %s738_s5 = scalar_lea.vmem %s3422_s30, %s3023_s13  ;;  %s3075_s10 = scalar_lea.vmem %s3423_s14, %s2251_s8 }
  0x6f   : > { %s744_s18 = scalar_lea.vmem %s3425_s22, %s3023_s13  ;;  %749 = sbr.rel (%p2158_p8) target bundleno = 118 (0x76), region = 88 }
  0x71   : > { %s741_s7 = scalar_lea.vmem %s3424_s2, %s3023_s13 }
  0x76 PF: > { %v2577_v1 = vld [vmem:[%s710_s15] sm:$0xff]   ;;  %v2772_v2 = vmov 0.0   ;;  %v2578_v3 = vld [vmem:[%s710_s15 + $0x8] sm:$0xff]   ;;  %vm2773_vm1 = vmmov 0   ;;  %vm781_vm2 = vcmask 261120   ;;  %s3426_s23 = scalar_lea.vmem %s3348_s4, %s3023_s13  ;;  %s2774_s17 = smov 96   ;;  %v885_v15 = vlaneseq }
  0x77   : > { %2299 = vmatprep.subr.bf16.mxu0 %v2772_v2  ;;  %2343 = vmatprep.subr.bf16.mxu1 %v2772_v2  ;;  %v3091_v4 = vld [vmem:[#allocation2] sm:$0xff]  ;;  %1209 = vst.msk [vmem:[#allocation3] sm:$0xff] %vm781_vm2, %v2772_v2  ;;  %1210 = vst.msk [vmem:[#allocation3 + $0x8] sm:$0xff] %vm781_vm2, %v2772_v2  ;;  %vm836_vm3 = vcmask 130048   ;;  %s3427_s21 = scalar_lea.vmem %s3345_s1, %s3020_s12  ;;  %vm891_vm4 = vcmask 64512   ;;  %s2775_s12 = smov 64  }
  0x78   : > { %2300 = vmatpush3.bf16.msra.mxu0 %v2577_v1  ;;  %2303 = vmatprep.mubr.msk.bf16.mxu0 %vm2773_vm1, %v2772_v2  ;;  %v757_v5 = vpack.c.bf16 %v3091_v4, %v3091_v4  ;;  %v2159_v6 = vld [vmem:[%s3426_s23] ss:$0 sm:$0xff]  ;;  %v886_v16 = vshrl.u32 %v885_v15, 7  ;;  %s2776_s20 = smov 80   ;;  %s2777_s9 = smov 112   ;;  %vm909_vm5 = vcmask 1043456  }
  0x79   : > { %2301 = vmatprep.subr.bf16.mxu0 %v2772_v2  ;;  %2347 = vmatprep.mubr.msk.bf16.mxu1 %vm2773_vm1, %v2772_v2  ;;  %v754_v17 = vld [vmem:[%s3427_s21] sm:$0x1]  ;;  %s2778_s30 = smov 48   ;;  %s3428_s14 = scalar_lea.vmem %s3350_s6, %s3023_s13  ;;  %vm1826_vm6 = vcmask 523264  }
  0x7a   : > { %v755_v18 = vmul.f32 -1e+09, %v754_v17  ;;  %v887_v19 = vsub.s32 0, %v886_v16  ;;  %v2579_v38 = vld [vmem:[%s3049_s26] sm:$0xff]   ;;  %s3429_s16 = sld [smem:[#allocation26_spill]]  ;;  %s3430_s29 = sld [smem:[#allocation25_spill]] }
  0x7b   : > { %s3431_s22 = sld [smem:[#allocation31_spill]]  ;;  %p2244_p4 = scmp.ne.s32.totalorder %s2751_s24, 1 }
  0x7c   : > { %2302 = vmatpush3.bf16.msra.mxu0 %v2578_v3  ;;  %v888_v20 = vrot.slane %v755_v18, %v887_v19 }
  0x7d   : > { %2307 = vmatprep.subr.bf16.mxu0 %v2772_v2 }
  0x7f   : > { %2304 = vmatmul.mubr.msk.bf16.vlgmr.msra.gmra.mrb[0].mxu0 %vm781_vm2, %v757_v5 }
  0x80   : > { %2309 = vmatprep.mubr.msk.bf16.mxu0 %vm2773_vm1, %v2772_v2 }
  0x81   : > { %s3432_s2 = scalar_lea.vmem %s3431_s22, %s3023_s13 }
 0x152   : > { %v819_v7 = vpop.f32.mrb[0].mxu0 }
 0x153   : > { %v820_v8 = vadd.f32 %v2159_v6, %v819_v7  ;;  %v2305_v9 = vpop.f32.mrb[1].mxu0  ;;  %v2580_v7 = vld [vmem:[%s3049_s26 + $0x8] sm:$0xff]  }
 0x154   : > { %v822_v10 = vpop.f32.mrb[2].mxu0 }
 0x155   : > { %v3111_v11 = vpack.c.bf16 %v820_v8, %v820_v8  ;;  %v2306_v12 = vpop.f32.mrb[3].mxu0 }
 0x157   : > { %834 = vrot.lane.b32.xlu0 %v3111_v11, %s2774_s17  ;;  %s3433_s17 = sld [smem:[#allocation32_spill]] }
 0x15d   : > { %s3434_s15 = scalar_lea.vmem %s3433_s17, %s3023_s13 }
 0x1c9   : > { %v835_v13 = vpop.permute.xlu0 %834 }
 0x1ca   : > { %v841_v14 = vsel %vm836_vm3, %v835_v13, 0 }
 0x1cb   : > { %2308 = vmatpush3.bf16.xpose.msra.mxu0 %v841_v14  ;;  %v2163_v14 = vld [vmem:[%s3428_s14] ss:$0 sm:$0xff] }
 0x1cc   : > { %2313 = vmatprep.subr.bf16.mxu0 %v2772_v2 }
 0x1d2   : > { %2310 = vmatmul.mubr.msk.bf16.vlgmr.msra.gmra.mrb[4].mxu0 %vm836_vm3, %v3111_v11 }
 0x1d3   : > { %2315 = vmatprep.mubr.msk.bf16.mxu0 %vm2773_vm1, %v2772_v2 }
 0x2a5   : > { %v877_v21 = vpop.f32.mrb[4].mxu0 }
 0x2a6   : > { %v883_v22 = vmul.f32 0.25, %v877_v21  ;;  %v2311_v23 = vpop.f32.mrb[5].mxu0 }
 0x2a7   : > { %v880_v24 = vpop.f32.mrb[6].mxu0  ;;  %v2779_v23 = vmov 0  }
 0x2a8   : > { %v2312_v25 = vpop.f32.mrb[7].mxu0  ;;  %v890_v26 = vadd.f32 %v888_v20, %v883_v22  ;;  %2575 = vset.pattern.permute.xlu1 %v2779_v23  ;;  %2576 = vset.pattern.permute.xlu0 %v2779_v23 }
 0x2aa   : > { %v892_v27 = vsel %vm891_vm4, %v890_v26, -inf }
 0x2ab   : > { %893 = vmax.xlane.f32.xlu0 %v892_v27 }
 0x338   : > { %v894_v28 = vpop.xlane.xlu0 %893 }
 0x339   : > { %v895_v29 = vsub.f32 %v890_v26, %v894_v28 }
 0x33b   : > { %v896_v30 = vmul.f32 1.442695, %v895_v29  ;;  %v756_v29 = vld [vmem:[%s3429_s16] sm:$0xff] }
 0x33d   : > { %2603 = vpow2.f32 %v896_v30  ;;  %v2581_v30 = vld [vmem:[%s3430_s29] sm:$0xff]  }
 0x33e   : > { %2344 = vmatpush3.bf16.msra.mxu1 %v2581_v30 }
 0x33f   : > { %2345 = vmatprep.subr.bf16.mxu1 %v2772_v2 }
 0x347   : > { %v2604_v31 = vpop.eup %2603 }
 0x348   : > { %v898_v32 = vsel %vm891_vm4, %v2604_v31, 0.0 }
 0x349   : > { %899 = vadd.xlane.f32.xlu1 %v898_v32 }
 0x35a   : > { %904 = vrot.lane.b32.xlu1 %v3111_v11, %s2775_s12 }
 0x35e   : > { %1008 = vrot.lane.b32.xlu1 %v3111_v11, %s2776_s20 }
 0x362   : > { %1006 = vrot.lane.b32.xlu1 %v3111_v11, %s2777_s9 }
 0x3d6   : > { %v900_v33 = vpop.xlane.xlu1 %899 }
 0x3d7   : > { %2605 = vrcp.f32 %v900_v33  ;;  %v2599_v33 = vld [vmem:[%s3075_s10] sm:$0xff]  }
 0x3da   : > { %v905_v34 = vpop.permute.xlu1 %904 }
 0x3db   : > { %v911_v35 = vsel %vm909_vm5, %v905_v34, 0 }
 0x3dc   : > { %2314 = vmatpush3.bf16.msra.mxu0 %v911_v35  ;;  %v2600_v35 = vld [vmem:[%s3075_s10 + $0x8] sm:$0xff]  }
 0x3dd   : > { %2319 = vmatprep.subr.bf16.mxu0 %v2772_v2 }
 0x3de   : > { %v1009_v40 = vpop.permute.xlu1 %1008 }
 0x3df   : > { %v1014_v45 = vsel %vm836_vm3, %v1009_v40, 0 }
 0x3e1   : > { %v2606_v36 = vpop.eup %2605 }
 0x3e2   : > { %v902_v37 = vmul.f32 %v2606_v36, %v2604_v31  ;;  %v1007_v47 = vpop.permute.xlu1 %1006 }
 0x3e4   : > { %v903_v39 = vpack.c.bf16 %v902_v37, %v902_v37  ;;  %v2174_v37 = vld [vmem:[%s3432_s2] ss:$0 sm:$0xff] }
 0x3e6   : > { %2316 = vmatmul.mubr.msk.bf16.vlgmr.msra.gmra.mrb[8].mxu0 %vm891_vm4, %v903_v39  ;;  %v2175_v39 = vld [vmem:[%s3434_s15] ss:$0 sm:$0xff] }
 0x3e7   : > { %2320 = vmatpush3.bf16.msra.mxu0 %v2579_v38  ;;  %2321 = vmatprep.mubr.msk.bf16.mxu0 %vm2773_vm1, %v2772_v2 }
 0x3e8   : > { %2325 = vmatprep.subr.bf16.mxu0 %v2772_v2 }
 0x4b9   : > { %v947_v41 = vpop.f32.mrb[8].mxu0 }
 0x4ba   : > { %v953_v42 = vpack.c.bf16 %v947_v41, %v947_v41  ;;  %v2317_v43 = vpop.f32.mrb[9].mxu0 }
 0x4bb   : > { %v950_v44 = vpop.f32.mrb[10].mxu0 }
 0x4bc   : > { %v2318_v46 = vpop.f32.mrb[11].mxu0  ;;  %2322 = vmatmul.mubr.msk.bf16.vlgmr.msra.gmra.mrb[12].mxu0 %vm836_vm3, %v953_v42 }
 0x4bd   : > { %2326 = vmatpush3.bf16.xpose.msra.mxu0 %v1014_v45  ;;  %2327 = vmatprep.mubr.msk.bf16.mxu0 %vm2773_vm1, %v2772_v2  ;;  %v2583_v45 = vld [vmem:[%s3430_s29 + $0x10] sm:$0xff]  }
 0x4be   : > { %2331 = vmatprep.subr.bf16.mxu0 %v2772_v2 }
 0x4c4   : > { %2328 = vmatmul.mubr.msk.bf16.vlgmr.msra.gmra.mrb[16].mxu0 %vm836_vm3, %v1007_v47  ;;  %v2584_v47 = vld [vmem:[%s3430_s29 + $0x18] sm:$0xff]  }
 0x4c5   : > { %2333 = vmatprep.mubr.msk.bf16.mxu0 %vm2773_vm1, %v2772_v2 }
 0x58f   : > { %v999_v48 = vpop.f32.mrb[12].mxu0 }
 0x590   : > { %v2323_v49 = vpop.f32.mrb[13].mxu0  ;;  %v1005_v15 = vadd.f32 %v2163_v14, %v999_v48 }
 0x591   : > { %v1002_v50 = vpop.f32.mrb[14].mxu0  ;;  %v2585_v49 = vld [vmem:[%s3430_s29 + $0x20] sm:$0xff]  }
 0x592   : > { %v2324_v51 = vpop.f32.mrb[15].mxu0 }
 0x593   : > { %v2586_v51 = vld [vmem:[%s3430_s29 + $0x28] sm:$0xff]  }
 0x597   : > { %v1050_v52 = vpop.f32.mrb[16].mxu0 }
 0x598   : > { %v1056_v53 = vmul.f32 0.25, %v1050_v52  ;;  %v2329_v54 = vpop.f32.mrb[17].mxu0 }
 0x599   : > { %v1053_v55 = vpop.f32.mrb[18].mxu0 }
 0x59a   : > { %v2330_v56 = vpop.f32.mrb[19].mxu0  ;;  %v1057_v57 = vadd.f32 %v1056_v53, %v888_v20  ;;  %v2587_v53 = vld [vmem:[%s3430_s29 + $0x30] sm:$0xff]   ;;  %v2588_v55 = vld [vmem:[%s3430_s29 + $0x38] sm:$0xff]  }
 0x59c   : > { %v1058_v58 = vsel %vm891_vm4, %v1057_v57, -inf }
 0x59d   : > { %1059 = vmax.xlane.f32.xlu1 %v1058_v58 }
 0x62a   : > { %v1060_v59 = vpop.xlane.xlu1 %1059 }
 0x62b   : > { %v1061_v60 = vsub.f32 %v1057_v57, %v1060_v59  ;;  %v2589_v57 = vld [vmem:[%s3430_s29 + $0x40] sm:$0xff]   ;;  %v2590_v59 = vld [vmem:[%s3430_s29 + $0x48] sm:$0xff]  }
 0x62d   : > { %v1062_v61 = vmul.f32 1.442695, %v1061_v60 }
 0x62f   : > { %2607 = vpow2.f32 %v1062_v61  ;;  %v2591_v61 = vld [vmem:[%s3430_s29 + $0x50] sm:$0xff]  }
 0x639   : > { %v2608_v62 = vpop.eup %2607 }
 0x63a   : > { %v1064_v63 = vsel %vm891_vm4, %v2608_v62, 0.0 }
 0x63b   : > { %1065 = vadd.xlane.f32.xlu0 %v1064_v63  ;;  %v2592_v63 = vld [vmem:[%s3430_s29 + $0x58] sm:$0xff]  }
 0x651   : > { %1070 = vrot.lane.b32.xlu0 %v3111_v11, %s2778_s30 }
 0x6c8   : > { %v1066_v0 = vpop.xlane.xlu0 %1065 }
 0x6c9   : > { %2609 = vrcp.f32 %v1066_v0 }
 0x6cc   : > { %v1071_v1 = vpop.permute.xlu0 %1070 }
 0x6cd   : > { %v1076_v3 = vsel %vm909_vm5, %v1071_v1, 0  ;;  %v2593_v1 = vld [vmem:[%s3430_s29 + $0x60] sm:$0xff]  }
 0x6ce   : > { %2332 = vmatpush3.bf16.msra.mxu0 %v1076_v3 }
 0x6cf   : > { %2337 = vmatprep.subr.bf16.mxu0 %v2772_v2 }
 0x6d3   : > { %v2610_v5 = vpop.eup %2609 }
 0x6d4   : > { %v1068_v6 = vmul.f32 %v2610_v5, %v2608_v62  ;;  %v2594_v5 = vld [vmem:[%s3430_s29 + $0x68] sm:$0xff]  }
 0x6d6   : > { %v1069_v8 = vpack.c.bf16 %v1068_v6, %v1068_v6 }
 0x6d8   : > { %2334 = vmatmul.mubr.msk.bf16.vlgmr.msra.gmra.mrb[20].mxu0 %vm891_vm4, %v1069_v8 }
 0x6d9   : > { %2338 = vmatpush3.bf16.msra.mxu0 %v2580_v7  ;;  %2339 = vmatprep.mubr.msk.bf16.mxu0 %vm2773_vm1, %v2772_v2  ;;  %v2595_v7 = vld [vmem:[%s3430_s29 + $0x70] sm:$0xff]  }
 0x6da   : > { %2415 = vmatprep.subr.bf16.mxu0 %v2772_v2 }
 0x7ab   : > { %v1112_v9 = vpop.f32.mrb[20].mxu0 }
 0x7ac   : > { %v1118_v10 = vpack.c.bf16 %v1112_v9, %v1112_v9  ;;  %v2335_v11 = vpop.f32.mrb[21].mxu0  ;;  %v2596_v9 = vld [vmem:[%s3430_s29 + $0x78] sm:$0xff]  }
 0x7ad   : > { %v1115_v12 = vpop.f32.mrb[22].mxu0  ;;  %v2597_v11 = vld [vmem:[%s3430_s29 + $0x80] sm:$0xff]  }
 0x7ae   : > { %v2336_v13 = vpop.f32.mrb[23].mxu0  ;;  %2340 = vmatmul.mubr.msk.bf16.vlgmr.msra.gmra.mrb[24].mxu0 %vm836_vm3, %v1118_v10 }
 0x7af   : > { %2423 = vmatprep.mubr.msk.bf16.mxu0 %vm2773_vm1, %v2772_v2  ;;  %2416 = vmatpush3.bf16.msra.mxu0 %v2599_v33  ;;  %v2598_v13 = vld [vmem:[%s3430_s29 + $0x88] sm:$0xff]  }
 0x7b0   : > { %2417 = vmatprep.subr.bf16.mxu0 %v2772_v2 }
 0x7b3   : > { %2418 = vmatpush3.bf16.msra.mxu0 %v2600_v35 }
 0x7b4   : > { %2419 = vmatprep.subr.bf16.mxu0 %v2772_v2 }
 0x881   : > { %v1165_v16 = vpop.f32.mrb[24].mxu0 }
 0x882   : > { %v1171_v17 = vadd.f32 %v1165_v16, %v1005_v15  ;;  %v2341_v18 = vpop.f32.mrb[25].mxu0  ;;  %v2601_v16 = vld [vmem:[%s3075_s10 + $0x10] sm:$0xff]  }
 0x883   : > { %v1168_v19 = vpop.f32.mrb[26].mxu0  ;;  %2420 = vmatpush3.bf16.msra.mxu0 %v2601_v16  ;;  %v2176_v18 = vld [vmem:[%s730_s3] ss:$0 sm:$0xff] }
 0x884   : > { %v2342_v20 = vpop.f32.mrb[27].mxu0  ;;  %v1172_v21 = vadd.f32 %v1171_v17, %v3091_v4  ;;  %v2582_v4 = vld [vmem:[%s3430_s29 + $0x8] sm:$0xff]   ;;  %2421 = vmatprep.subr.bf16.mxu0 %v2772_v2  ;;  %v2602_v17 = vld [vmem:[%s3075_s10 + $0x18] sm:$0xff]  }
 0x885   : > { %2346 = vmatpush3.bf16.msra.mxu1 %v2582_v4 }
 0x886   : > { %v1175_v22 = vsel %vm781_vm2, %v1172_v21, 0.0  ;;  %2351 = vmatprep.subr.bf16.mxu1 %v2772_v2 }
 0x887   : > { %1176 = vadd.xlane.f32.xlu0 %v1175_v22  ;;  %2422 = vmatpush3.bf16.msra.mxu0 %v2602_v17 }
 0x914   : > { %v1177_v24 = vpop.xlane.xlu0 %1176 }
 0x915   : > { %v1179_v25 = vmul.f32 0.03125, %v1177_v24 }
 0x917   : > { %v1180_v26 = vsub.f32 %v1172_v21, %v1179_v25 }
 0x919   : > { %v1181_v27 = vmul.f32 %v1180_v26, %v1180_v26 }
 0x91b   : > { %v1182_v28 = vsel %vm781_vm2, %v1181_v27, 0.0 }
 0x91c   : > { %1183 = vadd.xlane.f32.xlu1 %v1182_v28 }
 0x92d   : > { %1205 = vperm.xlu1 %2575, %v756_v29  }
 0x9a9   : > { %v1184_v31 = vpop.xlane.xlu1 %1183 }
 0x9aa   : > { %v1185_v32 = vmul.f32 0.03125, %v1184_v31 }
 0x9ac   : > { %v1186_v34 = vadd.f32 1e-05, %v1185_v32 }
 0x9ad   : > { %v3185_v41 = vpop.permute.xlu1 %1205 }
 0x9ae   : > { %2611 = vrsqrt.f32 %v1186_v34 }
 0x9b8   : > { %v2612_v36 = vpop.eup %2611 }
 0x9b9   : > { %v1188_v38 = vmul.f32 %v2612_v36, %v1180_v26 }
 0x9bb   : > { %v1195_v40 = vmul.f32 %v2174_v37, %v1188_v38 }
 0x9bd   : > { %v1202_v42 = vadd.f32 %v2175_v39, %v1195_v40 }
 0x9bf   : > { %v3188_v43 = vmul.f32 %v3185_v41, %v1202_v42  ;;  %v2242_v42 = vld [vmem:[%s741_s7] ss:$0 sm:$0xff] }
 0x9c1   : > { %1211 = vst.msk [vmem:[#allocation3 + $0x4] sm:$0xff] %vm781_vm2, %v3188_v43 }
 0x9c8   : > { %v1219_v44 = vld [vmem:[#allocation3] sm:$0xff]  ;;  %v1722_v14 = vld [vmem:[#allocation3 + $0x8] sm:$0xff] }
 0x9c9   : > { %v1220_v46 = vpack.c.bf16 %v1219_v44, %v1219_v44  ;;  %v1281_v48 = vld [vmem:[#allocation3 + $0x1] sm:$0xff]  ;;  %v1723_v15 = vpack.c.bf16 %v1722_v14, %v1722_v14  ;;  %v2243_v44 = vld [vmem:[%s744_s18] ss:$0 sm:$0xff] }
 0x9ca   : > { %v1282_v50 = vpack.c.bf16 %v1281_v48, %v1281_v48  ;;  %v1344_v52 = vld [vmem:[#allocation3 + $0x2] sm:$0xff] }
 0x9cb   : > { %2348 = vmatmul.mubr.msk.bf16.vlgmr.msra.gmra.mrb[0].mxu1 %vm781_vm2, %v1220_v46  ;;  %v1345_v54 = vpack.c.bf16 %v1344_v52, %v1344_v52  ;;  %v1407_v56 = vld [vmem:[#allocation3 + $0x3] sm:$0xff] }
 0x9cc   : > { %2352 = vmatpush3.bf16.msra.mxu1 %v2583_v45  ;;  %2355 = vmatprep.mubr.msk.bf16.mxu1 %vm2773_vm1, %v2772_v2  ;;  %v1408_v58 = vpack.c.bf16 %v1407_v56, %v1407_v56  ;;  %v1470_v60 = vld [vmem:[#allocation3 + $0x4] sm:$0xff] }
 0x9cd   : > { %2353 = vmatprep.subr.bf16.mxu1 %v2772_v2  ;;  %v1471_v62 = vpack.c.bf16 %v1470_v60, %v1470_v60  ;;  %v1533_v0 = vld [vmem:[#allocation3 + $0x5] sm:$0xff] }
 0x9ce   : > { %v1534_v3 = vpack.c.bf16 %v1533_v0, %v1533_v0  ;;  %v1596_v6 = vld [vmem:[#allocation3 + $0x6] sm:$0xff] }
 0x9cf   : > { %v1597_v8 = vpack.c.bf16 %v1596_v6, %v1596_v6  ;;  %v1659_v10 = vld [vmem:[#allocation3 + $0x7] sm:$0xff] }
 0x9d0   : > { %2354 = vmatpush3.bf16.msra.mxu1 %v2584_v47  ;;  %v1660_v12 = vpack.c.bf16 %v1659_v10, %v1659_v10 }
 0x9d1   : > { %2359 = vmatprep.subr.bf16.mxu1 %v2772_v2 }
 0x9d7   : > { %2356 = vmatmul.mubr.msk.bf16.vlgmr.msra.gmra.mrb[0].mxu1 %vm781_vm2, %v1282_v50 }
 0x9d8   : > { %2360 = vmatpush3.bf16.msra.mxu1 %v2585_v49  ;;  %2363 = vmatprep.mubr.msk.bf16.mxu1 %vm2773_vm1, %v2772_v2 }
 0x9d9   : > { %2361 = vmatprep.subr.bf16.mxu1 %v2772_v2 }
 0x9dc   : > { %2362 = vmatpush3.bf16.msra.mxu1 %v2586_v51 }
 0x9dd   : > { %2367 = vmatprep.subr.bf16.mxu1 %v2772_v2 }
 0x9e3   : > { %2364 = vmatmul.mubr.msk.bf16.vlgmr.msra.gmra.mrb[0].mxu1 %vm781_vm2, %v1345_v54 }
 0x9e4   : > { %2368 = vmatpush3.bf16.msra.mxu1 %v2587_v53  ;;  %2371 = vmatprep.mubr.msk.bf16.mxu1 %vm2773_vm1, %v2772_v2 }
 0x9e5   : > { %2369 = vmatprep.subr.bf16.mxu1 %v2772_v2 }
 0x9e8   : > { %2370 = vmatpush3.bf16.msra.mxu1 %v2588_v55 }
 0x9e9   : > { %2375 = vmatprep.subr.bf16.mxu1 %v2772_v2 }
 0x9ef   : > { %2372 = vmatmul.mubr.msk.bf16.vlgmr.msra.gmra.mrb[0].mxu1 %vm781_vm2, %v1408_v58 }
 0x9f0   : > { %2376 = vmatpush3.bf16.msra.mxu1 %v2589_v57  ;;  %2379 = vmatprep.mubr.msk.bf16.mxu1 %vm2773_vm1, %v2772_v2 }
 0x9f1   : > { %2377 = vmatprep.subr.bf16.mxu1 %v2772_v2 }
 0x9f4   : > { %2378 = vmatpush3.bf16.msra.mxu1 %v2590_v59 }
 0x9f5   : > { %2383 = vmatprep.subr.bf16.mxu1 %v2772_v2 }
 0x9fb   : > { %2380 = vmatmul.mubr.msk.bf16.vlgmr.msra.gmra.mrb[0].mxu1 %vm781_vm2, %v1471_v62 }
 0x9fc   : > { %2384 = vmatpush3.bf16.msra.mxu1 %v2591_v61  ;;  %2387 = vmatprep.mubr.msk.bf16.mxu1 %vm2773_vm1, %v2772_v2 }
 0x9fd   : > { %2385 = vmatprep.subr.bf16.mxu1 %v2772_v2 }
 0xa00   : > { %2386 = vmatpush3.bf16.msra.mxu1 %v2592_v63 }
 0xa01   : > { %2391 = vmatprep.subr.bf16.mxu1 %v2772_v2 }
 0xa07   : > { %2388 = vmatmul.mubr.msk.bf16.vlgmr.msra.gmra.mrb[0].mxu1 %vm781_vm2, %v1534_v3 }
 0xa08   : > { %2392 = vmatpush3.bf16.msra.mxu1 %v2593_v1  ;;  %2395 = vmatprep.mubr.msk.bf16.mxu1 %vm2773_vm1, %v2772_v2 }
 0xa09   : > { %2393 = vmatprep.subr.bf16.mxu1 %v2772_v2 }
 0xa0c   : > { %2394 = vmatpush3.bf16.msra.mxu1 %v2594_v5 }
 0xa0d   : > { %2399 = vmatprep.subr.bf16.mxu1 %v2772_v2 }
 0xa13   : > { %2396 = vmatmul.mubr.msk.bf16.vlgmr.msra.gmra.mrb[0].mxu1 %vm781_vm2, %v1597_v8 }
 0xa14   : > { %2400 = vmatpush3.bf16.msra.mxu1 %v2595_v7  ;;  %2403 = vmatprep.mubr.msk.bf16.mxu1 %vm2773_vm1, %v2772_v2 }
 0xa15   : > { %2401 = vmatprep.subr.bf16.mxu1 %v2772_v2 }
 0xa18   : > { %2402 = vmatpush3.bf16.msra.mxu1 %v2596_v9 }
 0xa19   : > { %2407 = vmatprep.subr.bf16.mxu1 %v2772_v2 }
 0xa1f   : > { %2404 = vmatmul.mubr.msk.bf16.vlgmr.msra.gmra.mrb[0].mxu1 %vm781_vm2, %v1660_v12 }
 0xa20   : > { %2408 = vmatpush3.bf16.msra.mxu1 %v2597_v11  ;;  %2411 = vmatprep.mubr.msk.bf16.mxu1 %vm2773_vm1, %v2772_v2 }
 0xa21   : > { %2409 = vmatprep.subr.bf16.mxu1 %v2772_v2  ;;  %v2236_v2 = vld [vmem:[%s738_s5] ss:$0 sm:$0xff] }
 0xa24   : > { %2410 = vmatpush3.bf16.msra.mxu1 %v2598_v13 }
 0xa2b   : > { %2412 = vmatmul.mubr.msk.bf16.vlgmr.msra.gmra.mrb[0].mxu1 %vm781_vm2, %v1723_v15 }
 0xafe   : > { %v1778_v19 = vpop.f32.mrb[0].mxu1 }
 0xaff   : > { %v2427_v20 = vadd.f32 %v2176_v18, %v1778_v19  ;;  %v2413_v21 = vpop.f32.mrb[1].mxu1 }
 0xb00   : > { %v1781_v22 = vpop.f32.mrb[2].mxu1 }
 0xb01   : > { %v1785_v23 = vmax.f32 %v2427_v20, 0.0  ;;  %v2414_v24 = vpop.f32.mrb[3].mxu1 }
 0xb03   : > { %v1786_v25 = vpack.c.bf16 %v1785_v23, %v1785_v23 }
 0xb05   : > { %2424 = vmatmul.mubr.msk.bf16.vlgmr.msra.gmra.mrb[28].mxu0 %vm1826_vm6, %v1786_v25 }
 0xbd8   : > { %v1864_v26 = vpop.f32.mrb[28].mxu0 }
 0xbd9   : > { %v1865_v27 = vadd.f32 %v2236_v2, %v1864_v26  ;;  %v2425_v28 = vpop.f32.mrb[29].mxu0 }
 0xbda   : > { %v1867_v29 = vpop.f32.mrb[30].mxu0 }
 0xbdb   : > { %v2426_v30 = vpop.f32.mrb[31].mxu0  ;;  %v1870_v4 = vadd.f32 %v1865_v27, %v3188_v43 }
 0xbdd   : > { %v1873_v31 = vsel %vm781_vm2, %v1870_v4, 0.0 }
 0xbde   : > { %1874 = vadd.xlane.f32.xlu1 %v1873_v31 }
 0xc6b   : > { %v1875_v32 = vpop.xlane.xlu1 %1874 }
 0xc6c   : > { %v1876_v33 = vmul.f32 0.03125, %v1875_v32 }
 0xc6e   : > { %v1877_v34 = vsub.f32 %v1870_v4, %v1876_v33 }
 0xc70   : > { %v1878_v35 = vmul.f32 %v1877_v34, %v1877_v34 }
 0xc72   : > { %v1879_v36 = vsel %vm781_vm2, %v1878_v35, 0.0 }
 0xc73   : > { %1880 = vadd.xlane.f32.xlu0 %v1879_v36 }
 0xd00   : > { %v1881_v37 = vpop.xlane.xlu0 %1880 }
 0xd01   : > { %v1882_v38 = vmul.f32 0.03125, %v1881_v37 }
 0xd03   : > { %v1883_v39 = vadd.f32 1e-05, %v1882_v38 }
 0xd05   : > { %2613 = vrsqrt.f32 %v1883_v39 }
 0xd0f   : > { %v2614_v40 = vpop.eup %2613 }
 0xd10   : > { %v1885_v43 = vmul.f32 %v2614_v40, %v1877_v34 }
 0xd12   : > { %v1892_v45 = vmul.f32 %v2242_v42, %v1885_v43  ;;  %1905 = sbr.rel (%p2244_p4) target bundleno = 3353 (0xd19), region = 92 }
 0xd14   : > { %v1899_v46 = vadd.f32 %v2243_v44, %v1892_v45 }
 0xd16   : > { %v1900_v47 = vmul.f32 %v1899_v46, %v3185_v41 }
 0xd18   : > { %1901 = vst.msk [vmem:[#allocation2] sm:$0xff] %vm781_vm2, %v1900_v47  ;;  %1906 = vst.msk [vmem:[%s694_s25] sm:$0xff] (!%p2244_p4), %vm781_vm2, %v1900_v47 }
 0xd19 PF: > { %s3439_s7 = sld [smem:[#allocation15_spill]]  ;;  %s3440_s16 = sld [smem:[#allocation11_spill]] }
 0xd1a   : > { %s3441_s29 = sld [smem:[#allocation23_spill]]  ;;  %s3442_s11 = sld [smem:[#allocation39_spill]] }
 0xd1b   : > { %s1921_s2 = sshll.u32 %s694_s25, 4  ;;  %s2780_s17 = smov [#allocation7]   ;;  %s1922_s2 = int_to_ptr.vmem [resolvable:$true] %s1921_s2 }
 0xd1c   : > { %s2645_s23 = scalar_lea.vmem %s1922_s2, 128  ;;  %s2649_s15 = sshll.u32 %s2780_s17, 4  ;;  %s2650_s15 = int_to_ptr.vmem [resolvable:$false] %s2649_s15 }
 0xd1d   : > { %p2646_p0 = scmp.ne.s32.totalorder %s1922_s2, %s2645_s23  ;;  %s2651_s28 = scalar_lea.vmem %s2650_s15, 256 }
 0xd1e   : > { %p2652_p9 = scmp.lt.s32.totalorder %s1922_s2, %s2650_s15  ;;  %p2653_p10 = scmp.lt.s32.totalorder %s2651_s28, %s2645_s23 }
 0xd1f   : > { %s2246_s13 = sshll.u32 %s3439_s7, 7  ;;  %s3443_s24 = sand.u32 1, %s3440_s16  }
 0xd20   : > { %s3284_s22 = scalar_lea.hbm %s3442_s11, %s2246_s13  ;;  %s1908_s8 = scalar_lea.sflag [#allocation6], %s3443_s24 }
 0xd21   : > { %p3444_p1 = scmp.ne.s32.totalorder %s3441_s29, 0  ;;  %p2654_p11 = por %p2653_p10, %p2652_p9 }
 0xd23   : > { %p2647_p3 = pnand %p2646_p0, %p3444_p1 }
 0xd25   : > { %p2648_p6 = pneg %p2647_p3 }
 0xd27   : > { %p2655_p5 = pnand %p2654_p11, %p2648_p6 }
 0xd29   : > { %2658 = shalt.err (!%p2655_p5)
}
 0xd2a   : > { %s2659_s27 = scalar_lea.hbm %s3284_s22, 128  ;;  %s2663_s12 = scalar_lea.hbm %s3442_s11, 256 }
 0xd2b   : > { %p2660_p7 = scmp.ne.s32.totalorder %s3284_s22, %s2659_s27  ;;  %p2664_p2 = scmp.lt.u32.totalorder %s3284_s22, %s3442_s11 }
 0xd2c   : > { %p2665_p8 = scmp.lt.u32.totalorder %s2663_s12, %s2659_s27  ;;  %p2667_p0 = scmp.lt.u32.totalorder %s2659_s27, %s3284_s22 }
 0xd2d   : > { %p2661_p13 = pnand %p2660_p7, %p3444_p1 }
 0xd2e   : > { %p2666_p4 = por %p2665_p8, %p2664_p2 }
 0xd2f   : > { %p2662_p12 = pneg %p2661_p13 }
 0xd30   : > { %p2668_p3 = por %p2667_p0, %p2666_p4 }
 0xd32   : > { %p2669_p6 = pnand %p2668_p3, %p2662_p12 }
 0xd34   : > { %2672 = shalt.err (!%p2669_p6)
}
 0xd35   : > { %2465 = dma.vmem_to_hbm [thread:$0]  (%p3444_p1), %s1922_s2, 128, %s3284_s22, %s1908_s8  }
 0xd36 PF: > { %s3445_s30 = sld [smem:[#allocation18_spill]]  ;;  %s3446_s3 = sld [smem:[#allocation10_spill]] }
 0xd37   : > { %s3447_s5 = sld [smem:[#allocation24_spill]] }
 0xd3c   : > { %p2476_p9 = scmp.ge.s32.totalorder %s3445_s30, 2  ;;  %s1933_s10 = sand.u32 1, %s3446_s3  }
 0xd3d   : > { %p3448_p10 = scmp.ne.s32.totalorder %s3447_s5, 0  ;;  %s1934_s26 = scalar_lea.sflag [#allocation6], %s1933_s10 }
 0xd3f   : > { %p2472_p11 = pnand %p2476_p9, %p3448_p10 }
 0xd41   : > { %2722 = dma.done.wait (!%p2472_p11), %s1934_s26, 128  }
 0xd42   : > { %2724 = vsyncadd (!%p2472_p11), %s1934_s26, 4294967168  ;;  %s31_s28 = sadd.s32 1, %s3445_s30   ;;  %s3449_s18 = sld [smem:[#allocation11_spill]] }
 0xd43   : > { %p28_p5 = scmp.ge.s32.totalorder %s31_s28, 6   ;;  %s3450_s19 = sld [smem:[#allocation12_spill]] }
 0xd44   : > { %s3451_s20 = sld [smem:[#allocation22_spill]]  ;;  %s3452_s21 = sld [smem:[#allocation13_spill]] }
 0xd45   : > { %s3453_s22 = sld [smem:[#allocation14_spill]]  ;;  %s3454_s23 = sld [smem:[#allocation21_spill]] }
 0xd46   : > { %s3455_s24 = sld [smem:[#allocation16_spill]]  ;;  %s3456_s25 = sld [smem:[#allocation17_spill]] }
 0xd47   : > { %s3457_s26 = sld [smem:[#allocation19_spill]]  ;;  %s3458_s27 = sld [smem:[#allocation20_spill]] }
 0xd48   :  { %30 = sbr.rel (!%p28_p5) target bundleno = 23 (0x17), region = 184 }
 0xd4f   :  { %1939 = vsyncpa [#allocation5], 1 }
 0xd50   :  { %1941 = vsyncpa [#allocation5 + $0x1], 1 }
 0xd51   :  { %1942 = vsyncpa [#allocation6], 1 }
 0xd52   :  { %1944 = vsyncpa [#allocation6 + $0x1], 1 }

</bundles_post_ra>
